<compile_context>
chip_gen: v5e
topology: v5e:2x2
jax: 0.10.0
libtpu: 0.0.40
codegen_flags: <defaults>
</compile_context>

<pallas_src>
import math

import jax
import jax.numpy as jnp
from jax import lax
from jax.experimental import pallas as pl
from jax.experimental.pallas import tpu as pltpu

LN_EPS = 1e-5  # torch.nn.LayerNorm default


def _round_up(a, b):
    return (a + b - 1) // b * b


def _physical_vmem_bytes():
    """Best-effort physical VMEM query; conservative (v7x) fallback."""
    try:
        info = pltpu.get_tpu_info()
        v = getattr(info, "vmem_capacity_bytes", None)
        if v:
            return int(v)
    except Exception:
        pass
    return 64 * 1024 * 1024


def _make_kernel(g, K, mxu_dtype):
    """LayerNorm(K per segment) + folded-affine Linear, on (tr, g*K) tiles."""
    hi = lax.Precision.HIGHEST

    if g == 1:
        def kernel(x_ref, w_ref, b_ref, o_ref):
            # x_ref: (tr, K)   w_ref: (K, D) folded weight   b_ref: (1, D)
            x = x_ref[...].astype(jnp.float32)
            mean = jnp.mean(x, axis=-1, keepdims=True)
            msq = jnp.mean(x * x, axis=-1, keepdims=True)
            var = jnp.maximum(msq - mean * mean, 0.0)
            rstd = lax.rsqrt(var + LN_EPS)
            xn = (x - mean) * rstd
            out = jnp.dot(xn.astype(mxu_dtype), w_ref[...],
                          preferred_element_type=jnp.float32)
            o_ref[...] = (out + b_ref[...]).astype(o_ref.dtype)
        return kernel

    inv_k = 1.0 / K

    def kernel(x_ref, s_ref, st_ref, w_ref, b_ref, o_ref):
        # x_ref:  (tr, g*K)   g logical rows packed side-by-side per row
        # s_ref:  (g*K, GP)   0/1 segment-selection mask   (f32, loop-invariant)
        # st_ref: (GP, g*K)   its transpose
        # w_ref:  (g*K, g*D)  block-diagonal folded weight  (mxu_dtype)
        # b_ref:  (1,  g*D)   folded bias (f32)
        # o_ref:  (tr, g*D)
        x = x_ref[...].astype(jnp.float32)
        S = s_ref[...]
        St = st_ref[...]
        # Per-segment stats via tiny 0/1 matmuls: the MXU has slack and this
        # avoids any cross-lane relayout.  Keep f32 + HIGHEST precision.
        sx = jnp.dot(x, S, preferred_element_type=jnp.float32,
                     precision=hi) * inv_k
        sxx = jnp.dot(x * x, S, preferred_element_type=jnp.float32,
                      precision=hi) * inv_k
        var = jnp.maximum(sxx - sx * sx, 0.0)
        rstd = lax.rsqrt(var + LN_EPS)
        shift = -sx * rstd
        # xn = (x - mean) * rstd applied as ONE broadcast FMA over the tile.
        xn = (x * jnp.dot(rstd, St, preferred_element_type=jnp.float32,
                          precision=hi)
              + jnp.dot(shift, St, preferred_element_type=jnp.float32,
                        precision=hi))
        out = jnp.dot(xn.astype(mxu_dtype), w_ref[...],
                      preferred_element_type=jnp.float32)
        o_ref[...] = (out + b_ref[...]).astype(o_ref.dtype)

    return kernel


def seg_merging(x, gamma, beta, weight, bias, win_size, *, tile_rows=512):
    """x: (B, ts_d, seg_num, d_model) -> (B, ts_d, ceil(seg_num/win), d_model)."""
    B, T, S, D = x.shape
    K = win_size * D

    # --- lane-packing factor: smallest g with (g*D) % 128 == 0, VMEM-capped ---
    mxu_dtype = jnp.bfloat16 if x.dtype == jnp.bfloat16 else jnp.float32
    mxu_itemsize = jnp.dtype(mxu_dtype).itemsize
    g = 1
    if D % 128 != 0:
        cand = 128 // math.gcd(D, 128)
        if cand * cand * K * D * mxu_itemsize <= 8 * 1024 * 1024:
            g = cand
    gK, gD = g * K, g * D

    # --- padding: win_size tail-repeat + lane-pack filler in ONE concatenate ---
    pad_seg = (win_size - S % win_size) % win_size
    M = (S + pad_seg) // win_size            # output seg count (module semantics)
    extra_m = 0
    if g > 1:
        while (B * T * (M + extra_m)) % g != 0:
            extra_m += 1                     # filler merged-rows per (b,t); < g
    parts = [x]
    if pad_seg > 0:
        parts.append(x[:, :, -pad_seg:, :])  # tail repeat (PyTorch semantics)
    if extra_m > 0:
        parts.append(jnp.zeros((B, T, extra_m * win_size, D), x.dtype))
    if len(parts) > 1:
        x = jnp.concatenate(parts, axis=-2)  # single copy; none if no padding
    Mp = M + extra_m
    Np = (B * T * Mp) // g

    # segment merge + lane packing == one contiguous reshape (no data movement)
    xp = x.reshape(Np, gK)

    # --- parameters: fold LayerNorm affine into the projection (f32) ---------
    w_eff = gamma.astype(jnp.float32)[:, None] * weight.T.astype(jnp.float32)  # (K, D)
    b_eff = (beta.astype(jnp.float32) @ weight.T.astype(jnp.float32)
             + bias.astype(jnp.float32))                                       # (D,)
    if g > 1:
        w_eff = jnp.kron(jnp.eye(g, dtype=jnp.float32), w_eff)  # block-diag (gK, gD)
    w_t = w_eff.astype(mxu_dtype)
    bias_p = jnp.tile(b_eff, g).reshape(1, gD)

    # per-segment selection masks, hoisted out of the kernel (tiny)
    GP = max(8, g)
    if g > 1:
        seg_of_col = jnp.arange(gK, dtype=jnp.int32) // K
        seg_ids = jnp.arange(GP, dtype=jnp.int32)
        s_mask = (seg_of_col[:, None] == seg_ids[None, :]).astype(jnp.float32)   # (gK, GP)
        st_mask = (seg_ids[:, None] == seg_of_col[None, :]).astype(jnp.float32)  # (GP, gK)

    # --- tile sizing: generation-aware VMEM budget ---------------------------
    itemsize = x.dtype.itemsize
    sub = 8 * max(1, 4 // itemsize)          # sublane quantum: 8 f32 / 16 bf16
    if _physical_vmem_bytes() >= 128 * 1024 * 1024:   # v5e / v6e
        budget, vmem_limit = 48 * 1024 * 1024, 64 * 1024 * 1024
    else:                                             # v7x (64 MiB per TC)
        budget, vmem_limit = 24 * 1024 * 1024, 32 * 1024 * 1024
    tr = max(sub, _round_up(min(int(tile_rows), 4096), sub))
    fixed = 2 * gK * gD * mxu_itemsize + 2 * gD * 4
    if g > 1:
        fixed += 4 * gK * GP * 4
    per_row = 2 * gK * itemsize + 2 * gD * itemsize + 5 * gK * 4  # I/O bufs + f32 temps
    tr = min(tr, max(sub, (budget - fixed) // per_row // sub * sub))
    # >= 4 grid steps when there is enough work: keeps a double-buffered DMA
    # pipeline alive on BOTH v7x TensorCores under ("parallel",).
    if Np >= 4 * sub:
        tr = min(tr, _round_up(-(-Np // 4), sub))
    elif Np >= 2 * sub:
        tr = min(tr, _round_up(-(-Np // 2), sub))
    if tr >= Np:
        tr = Np                               # single full-extent block

    if g > 1:
        in_specs = [
            pl.BlockSpec((tr, gK), lambda i: (i, 0)),
            pl.BlockSpec((gK, GP), lambda i: (0, 0)),
            pl.BlockSpec((GP, gK), lambda i: (0, 0)),
            pl.BlockSpec((gK, gD), lambda i: (0, 0)),
            pl.BlockSpec((1, gD), lambda i: (0, 0)),
        ]
        args = (xp, s_mask, st_mask, w_t, bias_p)
    else:
        in_specs = [
            pl.BlockSpec((tr, gK), lambda i: (i, 0)),
            pl.BlockSpec((gK, gD), lambda i: (0, 0)),
            pl.BlockSpec((1, gD), lambda i: (0, 0)),
        ]
        args = (xp, w_t, bias_p)

    out = pl.pallas_call(
        _make_kernel(g, K, mxu_dtype),
        out_shape=jax.ShapeDtypeStruct((Np, gD), x.dtype),
        grid_spec=pltpu.PrefetchScalarGridSpec(
            num_scalar_prefetch=0,
            grid=(pl.cdiv(Np, tr),),          # ragged last block handled by Pallas
            in_specs=in_specs,
            out_specs=pl.BlockSpec((tr, gD), lambda i: (i, 0)),
        ),
        compiler_params=pltpu.CompilerParams(
            dimension_semantics=("parallel",),
            vmem_limit_bytes=vmem_limit),
    )(*args)

    # unpack lanes (contiguous reshape) and drop per-(b,t) filler rows
    return out.reshape(B, T, Mp, D)[:, :, :M, :]


def seg_merging_ref(x, gamma, beta, weight, bias, win_size):
    """Pure-JAX reference mirroring the PyTorch forward."""
    pad_num = x.shape[2] % win_size
    if pad_num != 0:
        pad_num = win_size - pad_num
        x = jnp.concatenate([x, x[:, :, -pad_num:, :]], axis=-2)
    segs = [x[:, :, i::win_size, :] for i in range(win_size)]
    xm = jnp.concatenate(segs, axis=-1).astype(jnp.float32)
    mean = jnp.mean(xm, axis=-1, keepdims=True)
    var = jnp.mean((xm - mean) ** 2, axis=-1, keepdims=True)
    xn = (xm - mean) / jnp.sqrt(var + LN_EPS)
    xn = xn * gamma + beta
    return xn @ weight.T + bias


if __name__ == "__main__":
    def make_inputs(key, B, T, S, D, W):
        K = W * D
        kx, kg, kb, kw, kbias = jax.random.split(key, 5)
        x = jax.random.normal(kx, (B, T, S, D), dtype=jnp.float32)
        gamma = 1.0 + 0.1 * jax.random.normal(kg, (K,), dtype=jnp.float32)
        beta = 0.1 * jax.random.normal(kb, (K,), dtype=jnp.float32)
        weight = jax.random.normal(kw, (D, K), dtype=jnp.float32) / jnp.sqrt(K)
        bias = 0.1 * jax.random.normal(kbias, (D,), dtype=jnp.float32)
        return x, gamma, beta, weight, bias

    # Case 1: d_model < 128 (lane-packed, g=4); odd seg_num (win tail-repeat);
    #         multi-step grid with the hoisted S/St masks.
    x, gamma, beta, weight, bias = make_inputs(jax.random.PRNGKey(0), 2, 4, 15, 32, 2)
    out = jax.block_until_ready(seg_merging(x, gamma, beta, weight, bias, 2))
    ref = seg_merging_ref(x, gamma, beta, weight, bias, 2)
    assert out.shape == ref.shape, (out.shape, ref.shape)
    assert jnp.allclose(out, ref, atol=1e-4, rtol=1e-4), float(
        jnp.max(jnp.abs(out - ref)))

    # Case 2: d_model >= 128 (g == 1) with a ragged, multi-step grid.
    x2, g2, b2, w2, bi2 = make_inputs(jax.random.PRNGKey(1), 2, 3, 5, 128, 2)
    out2 = jax.block_until_ready(seg_merging(x2, g2, b2, w2, bi2, 2, tile_rows=8))
    ref2 = seg_merging_ref(x2, g2, b2, w2, bi2, 2)
    assert out2.shape == ref2.shape, (out2.shape, ref2.shape)
    assert jnp.allclose(out2, ref2, atol=2e-4, rtol=2e-4), float(
        jnp.max(jnp.abs(out2 - ref2)))

    # Case 3: d_model=48 (generalized packing, g=8) + lane-pack filler rows.
    x3, g3, b3, w3, bi3 = make_inputs(jax.random.PRNGKey(2), 2, 5, 7, 48, 3)
    out3 = jax.block_until_ready(seg_merging(x3, g3, b3, w3, bi3, 3))
    ref3 = seg_merging_ref(x3, g3, b3, w3, bi3, 3)
    assert out3.shape == ref3.shape, (out3.shape, ref3.shape)
    assert jnp.allclose(out3, ref3, atol=1e-4, rtol=1e-4), float(
        jnp.max(jnp.abs(out3 - ref3)))

    print("KERNEL_OK")
</pallas_src>

<mosaic_0001>
module attributes {stable_mosaic.version = 11 : i64} {
  func.func @kernel(%arg0: i32, %arg1: memref<8x256xf32, #tpu.memory_space<vmem>>, %arg2: memref<256x8xf32, #tpu.memory_space<vmem>>, %arg3: memref<8x256xf32, #tpu.memory_space<vmem>>, %arg4: memref<256x128xf32, #tpu.memory_space<vmem>>, %arg5: memref<1x128xf32, #tpu.memory_space<vmem>>, %arg6: memref<8x128xf32, #tpu.memory_space<vmem>>) attributes {dimension_semantics = [#tpu.dimension_semantics<parallel>], iteration_bounds = array<i64: 2>, scalar_prefetch = 0 : i64, scratch_operands = 0 : i64, tpu.core_type = #tpu.core_type<tc>, window_params = [{transform_indices = @transform_0, window_bounds = array<i64: 8, 256>}, {pipeline_mode = #tpu.pipeline_mode<synchronous>, transform_indices = @transform_1, window_bounds = array<i64: 256, 8>}, {pipeline_mode = #tpu.pipeline_mode<synchronous>, transform_indices = @transform_2, window_bounds = array<i64: 8, 256>}, {pipeline_mode = #tpu.pipeline_mode<synchronous>, transform_indices = @transform_3, window_bounds = array<i64: 256, 128>}, {pipeline_mode = #tpu.pipeline_mode<synchronous>, transform_indices = @transform_4, window_bounds = array<i64: 1, 128>}, {transform_indices = @transform_5, window_bounds = array<i64: 8, 128>}]} {
    %c0 = arith.constant 0 : index
    %c0_0 = arith.constant 0 : index
    %0 = vector.load %arg1[%c0, %c0_0] : memref<8x256xf32, #tpu.memory_space<vmem>>, vector<8x256xf32>
    %c0_1 = arith.constant 0 : index
    %c0_2 = arith.constant 0 : index
    %1 = vector.load %arg2[%c0_1, %c0_2] : memref<256x8xf32, #tpu.memory_space<vmem>>, vector<256x8xf32>
    %c0_3 = arith.constant 0 : index
    %c0_4 = arith.constant 0 : index
    %2 = vector.load %arg3[%c0_3, %c0_4] : memref<8x256xf32, #tpu.memory_space<vmem>>, vector<8x256xf32>
    %cst = arith.constant dense<0.000000e+00> : vector<8x8xf32>
    %3 = tpu.matmul %0, %1, %cst {dimension_numbers = #tpu.dot_dimension_numbers<[1], [0], [0], [1], [0, 0, 1, 1], [], []>, precision = #tpu.contract_precision<fp32>} : vector<8x256xf32>, vector<256x8xf32>, vector<8x8xf32> -> vector<8x8xf32>
    %cst_5 = arith.constant 1.562500e-02 : f32
    %4 = vector.broadcast %cst_5 : f32 to vector<8x8xf32>
    %5 = arith.mulf %3, %4 : vector<8x8xf32>
    %6 = arith.mulf %0, %0 : vector<8x256xf32>
    %cst_6 = arith.constant dense<0.000000e+00> : vector<8x8xf32>
    %7 = tpu.matmul %6, %1, %cst_6 {dimension_numbers = #tpu.dot_dimension_numbers<[1], [0], [0], [1], [0, 0, 1, 1], [], []>, precision = #tpu.contract_precision<fp32>} : vector<8x256xf32>, vector<256x8xf32>, vector<8x8xf32> -> vector<8x8xf32>
    %cst_7 = arith.constant 1.562500e-02 : f32
    %8 = vector.broadcast %cst_7 : f32 to vector<8x8xf32>
    %9 = arith.mulf %7, %8 : vector<8x8xf32>
    %10 = arith.mulf %5, %5 : vector<8x8xf32>
    %11 = arith.subf %9, %10 : vector<8x8xf32>
    %cst_8 = arith.constant 0.000000e+00 : f32
    %12 = vector.broadcast %cst_8 : f32 to vector<8x8xf32>
    %13 = arith.maximumf %11, %12 : vector<8x8xf32>
    %cst_9 = arith.constant 9.99999974E-6 : f32
    %14 = vector.broadcast %cst_9 : f32 to vector<8x8xf32>
    %15 = arith.addf %13, %14 : vector<8x8xf32>
    %16 = math.rsqrt %15 : vector<8x8xf32>
    %cst_10 = arith.constant 0.000000e+00 : f32
    %17 = vector.broadcast %cst_10 : f32 to vector<8x8xf32>
    %18 = arith.subf %17, %5 : vector<8x8xf32>
    %19 = arith.mulf %18, %16 : vector<8x8xf32>
    %cst_11 = arith.constant dense<0.000000e+00> : vector<8x256xf32>
    %20 = tpu.matmul %16, %2, %cst_11 {dimension_numbers = #tpu.dot_dimension_numbers<[1], [0], [0], [1], [0, 0, 1, 1], [], []>, precision = #tpu.contract_precision<fp32>} : vector<8x8xf32>, vector<8x256xf32>, vector<8x256xf32> -> vector<8x256xf32>
    %21 = arith.mulf %0, %20 : vector<8x256xf32>
    %cst_12 = arith.constant dense<0.000000e+00> : vector<8x256xf32>
    %22 = tpu.matmul %19, %2, %cst_12 {dimension_numbers = #tpu.dot_dimension_numbers<[1], [0], [0], [1], [0, 0, 1, 1], [], []>, precision = #tpu.contract_precision<fp32>} : vector<8x8xf32>, vector<8x256xf32>, vector<8x256xf32> -> vector<8x256xf32>
    %23 = arith.addf %21, %22 : vector<8x256xf32>
    %c0_13 = arith.constant 0 : index
    %c0_14 = arith.constant 0 : index
    %24 = vector.load %arg4[%c0_13, %c0_14] : memref<256x128xf32, #tpu.memory_space<vmem>>, vector<256x128xf32>
    %cst_15 = arith.constant dense<0.000000e+00> : vector<8x128xf32>
    %25 = tpu.matmul %23, %24, %cst_15 {dimension_numbers = #tpu.dot_dimension_numbers<[1], [0], [0], [1], [0, 0, 1, 1], [], []>} : vector<8x256xf32>, vector<256x128xf32>, vector<8x128xf32> -> vector<8x128xf32>
    %c0_16 = arith.constant 0 : index
    %c0_17 = arith.constant 0 : index
    %26 = vector.load %arg5[%c0_16, %c0_17] : memref<1x128xf32, #tpu.memory_space<vmem>>, vector<1x128xf32>
    %27 = vector.broadcast %26 : vector<1x128xf32> to vector<8x128xf32>
    %28 = arith.addf %25, %27 : vector<8x128xf32>
    %c0_18 = arith.constant 0 : index
    %c0_19 = arith.constant 0 : index
    %29 = vector.load %arg6[%c0_18, %c0_19] : memref<8x128xf32, #tpu.memory_space<vmem>>, vector<8x128xf32>
    tpu.vector_store %arg6[%c0_18, %c0_19], %28 {strides = array<i32>} : memref<8x128xf32, #tpu.memory_space<vmem>>, vector<8x128xf32>,
    return
  }
  func.func @transform_0(%arg0: i32) -> (i32, i32) {
    %c0_i32 = arith.constant 0 : i32
    %c0_i32_0 = arith.constant 0 : i32
    return %arg0, %c0_i32 : i32, i32
  }
  func.func @transform_1(%arg0: i32) -> (i32, i32) {
    %c0_i32 = arith.constant 0 : i32
    %c0_i32_0 = arith.constant 0 : i32
    %c0_i32_1 = arith.constant 0 : i32
    return %c0_i32, %c0_i32_0 : i32, i32
  }
  func.func @transform_2(%arg0: i32) -> (i32, i32) {
    %c0_i32 = arith.constant 0 : i32
    %c0_i32_0 = arith.constant 0 : i32
    %c0_i32_1 = arith.constant 0 : i32
    return %c0_i32, %c0_i32_0 : i32, i32
  }
  func.func @transform_3(%arg0: i32) -> (i32, i32) {
    %c0_i32 = arith.constant 0 : i32
    %c0_i32_0 = arith.constant 0 : i32
    %c0_i32_1 = arith.constant 0 : i32
    return %c0_i32, %c0_i32_0 : i32, i32
  }
  func.func @transform_4(%arg0: i32) -> (i32, i32) {
    %c0_i32 = arith.constant 0 : i32
    %c0_i32_0 = arith.constant 0 : i32
    %c0_i32_1 = arith.constant 0 : i32
    return %c0_i32, %c0_i32_0 : i32, i32
  }
  func.func @transform_5(%arg0: i32) -> (i32, i32) {
    %c0_i32 = arith.constant 0 : i32
    %c0_i32_0 = arith.constant 0 : i32
    return %arg0, %c0_i32 : i32, i32
  }
}

</mosaic_0001>

<bundles_post_ra>
// kernel: tpu_custom_call.1
= control target key start
LH: loop header
LB: loop body
LE: loop exit
PB: predicated region body
PF: predicated region fallthrough
CT: control target
= control target key end

     0   :  { %10 = vsyncpa [#allocation3], 0  ;;  %s3811_s0 = inlined_call_operand.hbm [shape: f32[16,256], index: 0, kind: input, shape index: {}]   ;;  %s3812_s1 = inlined_call_operand.vmem [shape: f32[256,8], index: 1, kind: input, shape index: {}]   ;;  %s3813_s2 = inlined_call_operand.vmem [shape: f32[8,256], index: 2, kind: input, shape index: {}]   ;;  %s3814_s3 = inlined_call_operand.vmem [shape: f32[256,128], index: 3, kind: input, shape index: {}]   ;;  %s3815_s4 = inlined_call_operand.vmem [shape: f32[1,128], index: 4, kind: input, shape index: {}]   ;;  %s3816_s5 = inlined_call_operand.hbm [shape: f32[16,128], index: 5, kind: output, shape index: {}]  }
   0x1   :  { %12 = vsyncpa [#allocation3 + $0x1], 0 }
   0x2   :  { %13 = vsyncpa [#allocation4], 0 }
   0x3   :  { %15 = vsyncpa [#allocation4 + $0x1], 0  ;;  %s2614_s18 = smov 0   ;;  %s2616_s19 = smov 0  }
   0x4   :  { %s2618_s20 = smov 0   ;;  %s2620_s21 = smov 0  }
   0x5 LB: > { %s2635_s22 = sadd.s32 4294967295, %s2582_s21   ;;  %s2421_s23 = sadd.s32 4294967294, %s2582_s21   ;;  %s2582_s21 = sphi %s2620_s21, %s4110_s21   ;;  %s2578_s20 = sphi %s2618_s20, %s4109_s20   ;;  %s2574_s19 = sphi %s2616_s19, %s4108_s19   ;;  %s2570_s18 = sphi %s2614_s18, %s4107_s18  }
   0x6   : > { %s2639_s24 = sadd.s32 1, %s2582_s21   ;;  %s28_s25 = sadd.s32 1, %s2578_s20 }
   0x7   : > { %s25_s26 = ssub.s32 %s2582_s21, %s2639_s24  ;;  %p35_p0 = scmp.ne.s32.totalorder %s2578_s20, %s2574_s19 }
   0x8   : > { %p26_p1 = scmp.eq.s32.totalorder %s25_s26, 0  ;;  %p36_p2 = scmp.eq.s32.totalorder %s2582_s21, 0 }
   0x9   : > { %p41_p3 = scmp.ne.s32.totalorder %s2574_s19, %s2570_s18  ;;  %p42_p4 = scmp.eq.s32.totalorder %s2635_s22, 0 }
   0xa   : > { %s2651_s27 = scalar_select %p26_p1, %s2578_s20, %s28_s25  }
   0xb   : > { %p2653_p5 = por %p36_p2, %p35_p0  ;;  %p2657_p6 = por %p42_p4, %p41_p3 }
   0xc   : > { %p149_p7 = scmp.eq.s32.totalorder %s2635_s22, 1  ;;  %p155_p8 = scmp.eq.s32.totalorder %s2421_s23, 1 }
   0xd   : > { %p2447_p10 = scmp.lt.s32.totalorder %s2582_s21, 2  ;;  %s187_s7 = sand.u32 1, %s2578_s20  }
   0xe   : > { %p2664_p11 = por %p149_p7, %p35_p0  ;;  %p2668_p12 = por %p155_p8, %p41_p3 }
   0xf   : > { %s2434_s8 = sshll.u32 %s2582_s21, 4  ;;  %s2424_s9 = sshll.u32 %s187_s7, 4 }
  0x10   : > { %s196_s12 = scalar_lea.hbm %s3811_s0, %s2434_s8  ;;  %s191_s14 = scalar_lea.vmem [#allocation2], %s2424_s9 }
  0x11   : > { %s198_s13 = sshll.u32 %s196_s12, 4  ;;  %s200_s15 = sshll.u32 %s191_s14, 4  ;;  %s199_s13 = int_to_ptr.hbm [resolvable:$true] %s198_s13  ;;  %s201_s15 = int_to_ptr.vmem [resolvable:$true] %s200_s15 }
  0x12   : > { %p2679_p13 = pnand %p2447_p10, %p2653_p5  ;;  %p2427_p0 = scmp.ge.s32.totalorder %s2582_s21, 1 }
  0x13   : > { %p205_p1 = scmp.lt.s32.totalorder %s2582_s21, 3  ;;  %s188_s17 = scalar_lea.sflag [#allocation3], %s187_s7 }
  0x14   : > { %s2486_s23 = sshra.s32 %s199_s13, 4  ;;  %p2490_p3 = pneg %p2679_p13  ;;  %s2487_s23 = int_to_ptr.hbm [resolvable:$true] %s2486_s23 }
  0x15   : > { %s2488_s25 = scalar_lea.hbm %s2487_s23, 16  ;;  %s2493_s28 = scalar_lea.hbm %s3811_s0, 32 }
  0x16   : > { %p2489_p2 = scmp.ne.s32.totalorder %s2487_s23, %s2488_s25  ;;  %p2494_p5 = scmp.lt.s32.totalorder %s2487_s23, %s3811_s0 }
  0x17   : > { %p2495_p8 = scmp.lt.s32.totalorder %s2493_s28, %s2488_s25 }
  0x18   : > { %p2491_p4 = pnand %p2490_p3, %p2489_p2 }
  0x19   : > { %p2496_p10 = por %p2495_p8, %p2494_p5 }
  0x1a   : > { %p2492_p7 = pneg %p2491_p4 }
  0x1c   : > { %p2497_p9 = pnand %p2496_p10, %p2492_p7 }
  0x1e   : > { %2500 = shalt.err (!%p2497_p9)
}
  0x1f   : > { %2442 = dma.hbm_to_vmem [thread:$0]  (!%p2679_p13), %s199_s13, 256, %s201_s15, %s188_s17  }
  0x20   : > { %p206_p2 = pnand %p2427_p0, %p205_p1 }
  0x22   : > { %209 = sbr.rel (%p206_p2) target bundleno = 763 (0x2fb), region = 40 }
  0x27   : > { %s2700_s7 = sand.u32 1, %s2574_s19  }
  0x28   : > { %s2428_s11 = sshll.u32 %s2700_s7, 4  ;;  %s212_s12 = scalar_lea.sflag [#allocation3], %s2700_s7 }
  0x29   : > { %s2704_s14 = scalar_lea.vmem [#allocation2], %s2428_s11 }
  0x2a   : > { %2561 = dma.done.wait (%p2657_p6), %s212_s12, 256  }
  0x2b   : > { %2563 = vsyncadd (%p2657_p6), %s212_s12, 4294967040  ;;  %v260_v0 = vld [vmem:[%s3812_s1 + $0x78] sm:$0xff]  ;;  %v259_v1 = vld [vmem:[%s3812_s1 + $0x70] sm:$0xff]  ;;  %vm1663_vm2 = vcmask 64512   ;;  %s2429_s29 = sshll.u32 %s2700_s7, 3  ;;  %s2431_s26 = sshll.u32 %s2635_s22, 3 }
  0x2c   : > { %v258_v2 = vld [vmem:[%s3812_s1 + $0x68] sm:$0xff]  ;;  %v2719_v3 = vand.u32 4294901760, %v260_v0  ;;  %v2721_v4 = vand.u32 4294901760, %v259_v1  ;;  %v257_v6 = vld [vmem:[%s3812_s1 + $0x60] sm:$0xff]  ;;  %v256_v7 = vld [vmem:[%s3812_s1 + $0x58] sm:$0xff]  ;;  %s2346_s11 = scalar_lea.hbm %s3816_s5, %s2431_s26  ;;  %s242_s12 = scalar_lea.vmem [#allocation5], %s2429_s29 }
  0x2d   : > { %v2723_v5 = vand.u32 4294901760, %v258_v2  ;;  %v255_v8 = vld [vmem:[%s3812_s1 + $0x50] sm:$0xff]  ;;  %v2734_v9 = vand.u32 4294901760, %v257_v6  ;;  %v2736_v10 = vand.u32 4294901760, %v256_v7  ;;  %v254_v12 = vld [vmem:[%s3812_s1 + $0x48] sm:$0xff]  ;;  %v253_v13 = vld [vmem:[%s3812_s1 + $0x40] sm:$0xff] }
  0x2e   : > { %3927 = vst [vmem:[#allocation8_spill] sm:$0xff] %v2719_v3  ;;  %v2738_v11 = vand.u32 4294901760, %v255_v8  ;;  %280 = vmatpush.msra.mxu0 %v2719_v3  ;;  %v2748_v14 = vsub.f32 %v260_v0, %v2719_v3  ;;  %v2751_v15 = vsub.f32 %v259_v1, %v2721_v4  ;;  %476 = vmatpush.msra.mxu3 %v2719_v3  ;;  %v2757_v17 = vand.u32 4294901760, %v254_v12  ;;  %v252_v18 = vld [vmem:[%s3812_s1 + $0x38] sm:$0xff]  ;;  %v251_v26 = vld [vmem:[%s3812_s1 + $0x30] sm:$0xff]  ;;  %v250_v34 = vld [vmem:[%s3812_s1 + $0x28] sm:$0xff] }
  0x2f   : > { %3928 = vst [vmem:[#allocation9_spill] sm:$0xff] %v2721_v4  ;;  %v2755_v16 = vsub.f32 %v258_v2, %v2723_v5  ;;  %v2763_v19 = vsub.f32 %v257_v6, %v2734_v9  ;;  %v2766_v20 = vsub.f32 %v256_v7, %v2736_v10  ;;  %v2782_v25 = vand.u32 4294901760, %v253_v13  ;;  %v249_v42 = vld [vmem:[%s3812_s1 + $0x20] sm:$0xff]  ;;  %v248_v48 = vld [vmem:[%s3812_s1 + $0x18] sm:$0xff]  ;;  %v247_v54 = vld [vmem:[%s3812_s1 + $0x10] sm:$0xff]  ;;  %s2348_s13 = sshll.u32 %s242_s12, 4  ;;  %s2349_s13 = int_to_ptr.vmem [resolvable:$true] %s2348_s13 }
  0x30   : > { %3929 = vst [vmem:[#allocation10_spill] sm:$0xff] %v2723_v5  ;;  %v2769_v21 = vsub.f32 %v255_v8, %v2738_v11  ;;  %282 = vmatpush.msra.mxu0 %v2721_v4  ;;  %423 = vmatpush.msra.mxu2 %v2748_v14  ;;  %v2774_v22 = vand.u32 4294901760, %v2748_v14  ;;  %v2777_v23 = vand.u32 4294901760, %v2751_v15  ;;  %v2791_v28 = vand.u32 4294901760, %v252_v18  ;;  %v276_v59 = vld [vmem:[%s3812_s1 + $0xf8] sm:$0xff]  ;;  %v246_v61 = vld [vmem:[%s3812_s1 + $0x8] sm:$0xff] }
  0x31   : > { %3930 = vst [vmem:[#allocation11_spill] sm:$0xff] %v2734_v9  ;;  %v2780_v24 = vand.u32 4294901760, %v2755_v16  ;;  %478 = vmatpush.msra.mxu3 %v2721_v4  ;;  %v2789_v27 = vand.u32 4294901760, %v2763_v19  ;;  %v2794_v29 = vsub.f32 %v254_v12, %v2757_v17  ;;  %v2805_v33 = vand.u32 4294901760, %v2766_v20  ;;  %v245_v2 = vld [vmem:[%s3812_s1] sm:$0xff]  ;;  %v275_v6 = vld [vmem:[%s3812_s1 + $0xf0] sm:$0xff] }
  0x32   : > { %3931 = vst [vmem:[#allocation12_spill] sm:$0xff] %v2736_v10  ;;  %284 = vmatpush.msra.mxu0 %v2723_v5  ;;  %426 = vmatpush.msra.mxu2 %v2751_v15  ;;  %v323_v30 = vsub.f32 %v2748_v14, %v2774_v22  ;;  %v329_v31 = vsub.f32 %v2751_v15, %v2777_v23  ;;  %v2811_v35 = vand.u32 4294901760, %v251_v26  ;;  %v2814_v36 = vand.u32 4294901760, %v2769_v21  ;;  %s2336_s22 = scalar_lea.sflag [#allocation4], %s2700_s7  ;;  %s2536_s25 = scalar_lea.hbm %s3816_s5, 16 }
  0x33   : > { %3932 = vst [vmem:[#allocation13_spill] sm:$0xff] %v2738_v11  ;;  %v335_v32 = vsub.f32 %v2755_v16, %v2780_v24  ;;  %480 = vmatpush.msra.mxu3 %v2723_v5  ;;  %v341_v39 = vsub.f32 %v2763_v19, %v2789_v27  ;;  %v2825_v40 = vsub.f32 %v253_v13, %v2782_v25  ;;  %v2828_v41 = vand.u32 4294901760, %v250_v34 }
  0x34   : > { %3933 = vst [vmem:[#allocation14_spill] sm:$0xff] %v2748_v14  ;;  %286 = vmatpush.msra.mxu0 %v2734_v9  ;;  %v2817_v37 = vand.u32 4294901760, %v323_v30  ;;  %429 = vmatpush.msra.mxu2 %v2755_v16  ;;  %v2820_v38 = vand.u32 4294901760, %v329_v31  ;;  %v347_v44 = vsub.f32 %v2766_v20, %v2805_v33  ;;  %v2840_v45 = vand.u32 4294901760, %v2794_v29 }
  0x35   : > { %3934 = vst [vmem:[#allocation15_spill] sm:$0xff] %v2751_v15  ;;  %482 = vmatpush.msra.mxu3 %v2734_v9  ;;  %v2835_v43 = vand.u32 4294901760, %v335_v32  ;;  %v2843_v46 = vsub.f32 %v252_v18, %v2791_v28  ;;  %v353_v47 = vsub.f32 %v2769_v21, %v2814_v36  ;;  %v2854_v49 = vand.u32 4294901760, %v341_v39  ;;  %v274_v32 = vld [vmem:[%s3812_s1 + $0xe8] sm:$0xff] }
  0x36   : > { %3935 = vst [vmem:[#allocation16_spill] sm:$0xff] %v2755_v16  ;;  %288 = vmatpush.msra.mxu0 %v2736_v10  ;;  %325 = vmatpush.msra.mxu1 %v2817_v37  ;;  %v2856_v50 = vand.u32 4294901760, %v249_v42  ;;  %v2859_v51 = vand.u32 4294901760, %v2825_v40  ;;  %v2862_v52 = vsub.f32 %v251_v26, %v2811_v35  ;;  %v2867_v53 = vsub.f32 %v250_v34, %v2828_v41 }
  0x37   : > { %3936 = vst [vmem:[#allocation17_spill] sm:$0xff] %v2757_v17  ;;  %432 = vmatpush.msra.mxu2 %v2763_v19  ;;  %484 = vmatpush.msra.mxu3 %v2736_v10  ;;  %v2874_v55 = vand.u32 4294901760, %v347_v44  ;;  %v359_v56 = vsub.f32 %v2794_v29, %v2840_v45  ;;  %v2878_v57 = vand.u32 4294901760, %v248_v48  ;;  %v2881_v58 = vand.u32 4294901760, %v2843_v46 }
  0x38   : > { %3937 = vst [vmem:[#allocation18_spill] sm:$0xff] %v2763_v19  ;;  %290 = vmatpush.msra.mxu0 %v2738_v11  ;;  %331 = vmatpush.msra.mxu1 %v2820_v38  ;;  %v2887_v60 = vand.u32 4294901760, %v353_v47  ;;  %v365_v62 = vsub.f32 %v2825_v40, %v2859_v51  ;;  %v2897_v63 = vand.u32 4294901760, %v247_v54  ;;  %v2900_v0 = vand.u32 4294901760, %v2862_v52 }
  0x39   : > { %3938 = vst [vmem:[#allocation19_spill] sm:$0xff] %v2766_v20  ;;  %435 = vmatpush.msra.mxu2 %v2766_v20  ;;  %486 = vmatpush.msra.mxu3 %v2738_v11  ;;  %v2903_v1 = vsub.f32 %v249_v42, %v2856_v50  ;;  %v2914_v7 = vand.u32 4294901760, %v2867_v53  ;;  %v2916_v8 = vand.u32 4294901760, %v276_v59  ;;  %v2920_v12 = vand.u32 4294901760, %v359_v56  ;;  %v273_v56 = vld [vmem:[%s3812_s1 + $0xe0] sm:$0xff] }
  0x3a   : > { %3939 = vst [vmem:[#allocation20_spill] sm:$0xff] %v2769_v21  ;;  %292 = vmatpush.msra.mxu0 %v2757_v17  ;;  %337 = vmatpush.msra.mxu1 %v2835_v43  ;;  %v371_v13 = vsub.f32 %v2843_v46, %v2881_v58  ;;  %v2924_v18 = vand.u32 4294901760, %v246_v61  ;;  %v2927_v26 = vsub.f32 %v248_v48, %v2878_v57  ;;  %v2931_v30 = vand.u32 4294901760, %v245_v2 }
  0x3b   : > { %3940 = vst [vmem:[#allocation21_spill] sm:$0xff] %v2774_v22  ;;  %438 = vmatpush.msra.mxu2 %v2769_v21  ;;  %488 = vmatpush.msra.mxu3 %v2757_v17  ;;  %v2933_v31 = vand.u32 4294901760, %v275_v6  ;;  %v2940_v34 = vand.u32 4294901760, %v365_v62  ;;  %v377_v39 = vsub.f32 %v2862_v52, %v2900_v0  ;;  %v2945_v42 = vand.u32 4294901760, %v2903_v1 }
  0x3c   : > { %3941 = vst [vmem:[#allocation22_spill] sm:$0xff] %v2777_v23  ;;  %294 = vmatpush.msra.mxu0 %v2782_v25  ;;  %343 = vmatpush.msra.mxu1 %v2854_v49  ;;  %v2948_v44 = vsub.f32 %v247_v54, %v2897_v63  ;;  %v383_v47 = vsub.f32 %v2867_v53, %v2914_v7  ;;  %v2962_v54 = vand.u32 4294901760, %v371_v13  ;;  %v2965_v62 = vand.u32 4294901760, %v2927_v26  ;;  %v272_v13 = vld [vmem:[%s3812_s1 + $0xd8] sm:$0xff] }
  0x3d   : > { %3942 = vst [vmem:[#allocation23_spill] sm:$0xff] %v2780_v24  ;;  %441 = vmatpush.msra.mxu2 %v2794_v29  ;;  %490 = vmatpush.msra.mxu3 %v2782_v25  ;;  %v2955_v48 = vsub.f32 %v276_v59, %v2916_v8  ;;  %v2975_v59 = vsub.f32 %v245_v2, %v2931_v30  ;;  %v2992_v2 = vand.u32 4294901760, %v273_v56 }
  0x3e   : > { %3943 = vst [vmem:[#allocation24_spill] sm:$0xff] %v2789_v27  ;;  %296 = vmatpush.msra.mxu0 %v2791_v28  ;;  %349 = vmatpush.msra.mxu1 %v2874_v55 }
  0x3f   : > { %3944 = vst [vmem:[#allocation25_spill] sm:$0xff] %v2794_v29  ;;  %444 = vmatpush.msra.mxu2 %v2825_v40  ;;  %492 = vmatpush.msra.mxu3 %v2791_v28  ;;  %v3014_v29 = vand.u32 4294901760, %v272_v13  ;;  %v3034_v20 = vsub.f32 %v273_v56, %v2992_v2 }
  0x40   : > { %3945 = vst [vmem:[#allocation26_spill] sm:$0xff] %v2805_v33  ;;  %298 = vmatpush.msra.mxu0 %v2811_v35  ;;  %355 = vmatpush.msra.mxu1 %v2887_v60 }
  0x41   : > { %3946 = vst [vmem:[#allocation27_spill] sm:$0xff] %v2814_v36  ;;  %447 = vmatpush.msra.mxu2 %v2843_v46  ;;  %494 = vmatpush.msra.mxu3 %v2811_v35 }
  0x42   : > { %3947 = vst [vmem:[#allocation28_spill] sm:$0xff] %v2817_v37  ;;  %300 = vmatpush.msra.mxu0 %v2828_v41  ;;  %361 = vmatpush.msra.mxu1 %v2920_v12 }
  0x43   : > { %3948 = vst [vmem:[#allocation29_spill] sm:$0xff] %v2820_v38  ;;  %450 = vmatpush.msra.mxu2 %v2862_v52  ;;  %496 = vmatpush.msra.mxu3 %v2828_v41  ;;  %v269_v38 = vld [vmem:[%s3812_s1 + $0xc0] sm:$0xff] }
  0x44   : > { %3949 = vst [vmem:[#allocation30_spill] sm:$0xff] %v2825_v40  ;;  %v2978_v40 = vsub.f32 %v275_v6, %v2933_v31  ;;  %302 = vmatpush.msra.mxu0 %v2856_v50  ;;  %367 = vmatpush.msra.mxu1 %v2940_v34  ;;  %v2995_v6 = vand.u32 4294901760, %v383_v47  ;;  %v3063_v15 = vand.u32 4294901760, %v269_v38 }
  0x45   : > { %3950 = vst [vmem:[#allocation31_spill] sm:$0xff] %v2835_v43  ;;  %453 = vmatpush.msra.mxu2 %v2867_v53  ;;  %498 = vmatpush.msra.mxu3 %v2856_v50 }
  0x46   : > { %3951 = vst [vmem:[#allocation32_spill] sm:$0xff] %v2840_v45  ;;  %304 = vmatpush.msra.mxu0 %v2878_v57  ;;  %373 = vmatpush.msra.mxu1 %v2962_v54  ;;  %v3025_v21 = vand.u32 4294901760, %v2978_v40 }
  0x47   : > { %3952 = vst [vmem:[#allocation33_spill] sm:$0xff] %v2843_v46  ;;  %v2968_v46 = vsub.f32 %v246_v61, %v2924_v18  ;;  %v2985_v61 = vand.u32 4294901760, %v377_v39  ;;  %v271_v39 = vld [vmem:[%s3812_s1 + $0xd0] sm:$0xff]  ;;  %456 = vmatpush.msra.mxu2 %v2903_v1  ;;  %500 = vmatpush.msra.mxu3 %v2878_v57 }
  0x48   : > { %3953 = vst [vmem:[#allocation34_spill] sm:$0xff] %v2854_v49  ;;  %v270_v49 = vld [vmem:[%s3812_s1 + $0xc8] sm:$0xff]  ;;  %306 = vmatpush.msra.mxu0 %v2897_v63  ;;  %v670_v16 = vsub.f32 %v2978_v40, %v3025_v21 }
  0x49   : > { %3954 = vst [vmem:[#allocation35_spill] sm:$0xff] %v2859_v51  ;;  %379 = vmatpush.msra.mxu1 %v2985_v61  ;;  %459 = vmatpush.msra.mxu2 %v2927_v26 }
  0x4a   : > { %3955 = vst [vmem:[#allocation36_spill] sm:$0xff] %v2862_v52  ;;  %v389_v52 = vsub.f32 %v2903_v1, %v2945_v42  ;;  %502 = vmatpush.msra.mxu3 %v2897_v63  ;;  %308 = vmatpush.msra.mxu0 %v2924_v18 }
  0x4b   : > { %3956 = vst [vmem:[#allocation37_spill] sm:$0xff] %v2867_v53  ;;  %v3009_v53 = vand.u32 4294901760, %v2968_v46  ;;  %385 = vmatpush.msra.mxu1 %v2995_v6  ;;  %462 = vmatpush.msra.mxu2 %v2948_v44 }
  0x4c   : > { %3957 = vst [vmem:[#allocation38_spill] sm:$0xff] %v2874_v55  ;;  %v2999_v55 = vand.u32 4294901760, %v2955_v48  ;;  %504 = vmatpush.msra.mxu3 %v2924_v18  ;;  %310 = vmatpush.msra.mxu0 %v2931_v30 }
  0x4d   : > { %3958 = vst [vmem:[#allocation39_spill] sm:$0xff] %v2881_v58  ;;  %v407_v19 = vsub.f32 %v2968_v46, %v3009_v53  ;;  %465 = vmatpush.msra.mxu2 %v2968_v46 }
  0x4e   : > { %3959 = vst [vmem:[#allocation40_spill] sm:$0xff] %v2887_v60  ;;  %v2970_v60 = vand.u32 4294901760, %v274_v32  ;;  %517 = vmatpush.msrb.mxu0 %v2774_v22  ;;  %506 = vmatpush.msra.mxu3 %v2931_v30 }
  0x4f   : > { %3960 = vst [vmem:[#allocation41_spill] sm:$0xff] %v2900_v0  ;;  %468 = vmatpush.msra.mxu2 %v2975_v59 }
  0x50   : > { %3961 = vst [vmem:[#allocation42_spill] sm:$0xff] %v2903_v1  ;;  %v3012_v47 = vsub.f32 %v274_v32, %v2970_v60  ;;  %v3029_v32 = vand.u32 4294901760, %v389_v52  ;;  %v3036_v1 = vand.u32 4294901760, %v271_v39  ;;  %v664_v52 = vsub.f32 %v2955_v48, %v2999_v55  ;;  %521 = vmatpush.msrb.mxu0 %v2777_v23 }
  0x51   : > { %3962 = vst [vmem:[#allocation43_spill] sm:$0xff] %v2914_v7  ;;  %621 = vmatpush.msrb.mxu2 %v2916_v8 }
  0x52   : > { %3963 = vst [vmem:[#allocation44_spill] sm:$0xff] %v2920_v12  ;;  %v2990_v12 = vand.u32 4294901760, %v2948_v44  ;;  %v3054_v37 = vand.u32 4294901760, %v3012_v47  ;;  %391 = vmatpush.msra.mxu1 %v3029_v32  ;;  %v3078_v14 = vsub.f32 %v271_v39, %v3036_v1  ;;  %525 = vmatpush.msrb.mxu0 %v2780_v24 }
  0x53   : > { %3964 = vst [vmem:[#allocation45_spill] sm:$0xff] %v2924_v18  ;;  %623 = vmatpush.msrb.mxu2 %v2933_v31 }
  0x54   : > { %3965 = vst [vmem:[#allocation46_spill] sm:$0xff] %v2927_v26  ;;  %v401_v43 = vsub.f32 %v2948_v44, %v2990_v12  ;;  %v676_v39 = vsub.f32 %v3012_v47, %v3054_v37  ;;  %529 = vmatpush.msrb.mxu0 %v2789_v27 }
  0x55   : > { %3966 = vst [vmem:[#allocation47_spill] sm:$0xff] %v2940_v34  ;;  %v395_v34 = vsub.f32 %v2927_v26, %v2965_v62  ;;  %v3057_v26 = vsub.f32 %v272_v13, %v3014_v29  ;;  %625 = vmatpush.msrb.mxu2 %v2970_v60 }
  0x56   : > { %3967 = vst [vmem:[#allocation48_spill] sm:$0xff] %v2948_v44  ;;  %v3075_v44 = vand.u32 4294901760, %v3034_v20  ;;  %533 = vmatpush.msrb.mxu0 %v2805_v33 }
  0x57   : > { %3968 = vst [vmem:[#allocation49_spill] sm:$0xff] %v2962_v54  ;;  %v3022_v54 = vand.u32 4294901760, %v2975_v59  ;;  %v3049_v56 = vand.u32 4294901760, %v395_v34  ;;  %v268_v34 = vld [vmem:[%s3812_s1 + $0xb8] sm:$0xff]  ;;  %627 = vmatpush.msrb.mxu2 %v2992_v2 }
  0x58   : > { %3969 = vst [vmem:[#allocation50_spill] sm:$0xff] %v2965_v62  ;;  %v682_v23 = vsub.f32 %v3034_v20, %v3075_v44  ;;  %537 = vmatpush.msrb.mxu0 %v2814_v36 }
  0x59   : > { %3970 = vst [vmem:[#allocation51_spill] sm:$0xff] %v2968_v46  ;;  %v413_v13 = vsub.f32 %v2975_v59, %v3022_v54  ;;  %397 = vmatpush.msra.mxu1 %v3049_v56  ;;  %v3097_v46 = vand.u32 4294901760, %v3057_v26  ;;  %629 = vmatpush.msrb.mxu2 %v3014_v29 }
  0x5a   : > { %3971 = vst [vmem:[#allocation52_spill] sm:$0xff] %v2975_v59  ;;  %v3118_v59 = vand.u32 4294901760, %v3078_v14  ;;  %541 = vmatpush.msrb.mxu0 %v2840_v45 }
  0x5b   : > { %3972 = vst [vmem:[#allocation53_spill] sm:$0xff] %v2985_v61  ;;  %v3045_v61 = vand.u32 4294901760, %v270_v49  ;;  %v3113_v22 = vand.u32 4294901760, %v413_v13  ;;  %v265_v13 = vld [vmem:[%s3812_s1 + $0xa0] sm:$0xff]  ;;  %631 = vmatpush.msrb.mxu2 %v3036_v1 }
  0x5c   : > { %3973 = vst [vmem:[#allocation54_spill] sm:$0xff] %v2990_v12  ;;  %545 = vmatpush.msrb.mxu0 %v2859_v51 }
  0x5d   : > { %3974 = vst [vmem:[#allocation55_spill] sm:$0xff] %v2995_v6  ;;  %v3070_v6 = vand.u32 4294901760, %v401_v43  ;;  %v3085_v18 = vsub.f32 %v270_v49, %v3045_v61  ;;  %v267_v43 = vld [vmem:[%s3812_s1 + $0xb0] sm:$0xff]  ;;  %v3103_v49 = vand.u32 4294901760, %v670_v16  ;;  %633 = vmatpush.msrb.mxu2 %v3045_v61 }
  0x5e   : > { %3975 = vst [vmem:[#allocation56_spill] sm:$0xff] %v3009_v53  ;;  %v3120_v16 = vand.u32 4294901760, %v267_v43  ;;  %549 = vmatpush.msrb.mxu0 %v2881_v58 }
  0x5f   : > { %3976 = vst [vmem:[#allocation57_spill] sm:$0xff] %v3025_v21  ;;  %v3082_v21 = vand.u32 4294901760, %v664_v52  ;;  %v3099_v52 = vand.u32 4294901760, %v268_v34  ;;  %403 = vmatpush.msra.mxu1 %v3070_v6  ;;  %635 = vmatpush.msrb.mxu2 %v3063_v15 }
  0x60   : > { %3977 = vst [vmem:[#allocation58_spill] sm:$0xff] %v3029_v32  ;;  %v3091_v32 = vand.u32 4294901760, %v407_v19  ;;  %v266_v19 = vld [vmem:[%s3812_s1 + $0xa8] sm:$0xff]  ;;  %v3156_v27 = vsub.f32 %v267_v43, %v3120_v16  ;;  %553 = vmatpush.msrb.mxu0 %v2900_v0 }
  0x61   : > { %3978 = vst [vmem:[#allocation59_spill] sm:$0xff] %v3049_v56  ;;  %v3106_v56 = vsub.f32 %v269_v38, %v3063_v15  ;;  %666 = vmatpush.msrb.mxu3 %v3082_v21  ;;  %v3125_v38 = vand.u32 4294901760, %v3085_v18  ;;  %v3137_v24 = vsub.f32 %v268_v34, %v3099_v52  ;;  %v694_v34 = vsub.f32 %v3078_v14, %v3118_v59  ;;  %v3269_v0 = vld [vmem:[%s2704_s14 + $0x8] sm:$0xff] }
  0x62   : > { %3979 = vst [vmem:[#allocation60_spill] sm:$0xff] %v3054_v37  ;;  %409 = vmatpush.msra.mxu1 %v3091_v32  ;;  %637 = vmatpush.msrb.mxu2 %v3099_v52 }
  0x63   : > { %3980 = vst [vmem:[#allocation61_spill] sm:$0xff] %v3070_v6  ;;  %v3132_v6 = vand.u32 4294901760, %v676_v39  ;;  %672 = vmatpush.msrb.mxu3 %v3103_v49  ;;  %v3144_v37 = vand.u32 4294901760, %v3106_v56  ;;  %v264_v39 = vld [vmem:[%s3812_s1 + $0x98] sm:$0xff]  ;;  %v3172_v43 = vand.u32 4294901760, %v3137_v24  ;;  %557 = vmatpush.msrb.mxu0 %v2914_v7 }
  0x64   : > { %3981 = vst [vmem:[#allocation62_spill] sm:$0xff] %v3075_v44  ;;  %v688_v44 = vsub.f32 %v3057_v26, %v3097_v46  ;;  %415 = vmatpush.msra.mxu1 %v3113_v22  ;;  %v3177_v33 = vand.u32 4294901760, %v264_v39  ;;  %639 = vmatpush.msrb.mxu2 %v3120_v16 }
  0x65   : > { %3982 = vst [vmem:[#allocation63_spill] sm:$0xff] %v3082_v21  ;;  %v3139_v21 = vand.u32 4294901760, %v266_v19  ;;  %678 = vmatpush.msrb.mxu3 %v3132_v6  ;;  %561 = vmatpush.msrb.mxu0 %v2945_v42 }
  0x66   : > { %3983 = vst [vmem:[#allocation64_spill] sm:$0xff] %v3085_v18  ;;  %584 = vmatpush.msrb.mxu1 %v2719_v3  ;;  %v706_v3 = vsub.f32 %v3106_v56, %v3144_v37  ;;  %v3216_v45 = vsub.f32 %v264_v39, %v3177_v33 }
  0x67   : > { %3984 = vst [vmem:[#allocation65_spill] sm:$0xff] %v3091_v32  ;;  %v3151_v32 = vand.u32 4294901760, %v682_v23  ;;  %v3169_v23 = vand.u32 4294901760, %v688_v44  ;;  %v263_v44 = vld [vmem:[%s3812_s1 + $0x90] sm:$0xff]  ;;  %641 = vmatpush.msrb.mxu2 %v3139_v21  ;;  %565 = vmatpush.msrb.mxu0 %v2965_v62 }
  0x68   : > { %3985 = vst [vmem:[#allocation66_spill] sm:$0xff] %v3097_v46  ;;  %v700_v46 = vsub.f32 %v3085_v18, %v3125_v38  ;;  %586 = vmatpush.msrb.mxu1 %v2721_v4 }
  0x69   : > { %3986 = vst [vmem:[#allocation67_spill] sm:$0xff] %v3103_v49  ;;  %v3158_v49 = vand.u32 4294901760, %v265_v13  ;;  %684 = vmatpush.msrb.mxu3 %v3151_v32  ;;  %569 = vmatpush.msrb.mxu0 %v2990_v12 }
  0x6a   : > { %3987 = vst [vmem:[#allocation68_spill] sm:$0xff] %v3113_v22  ;;  %v3165_v22 = vld [vmem:[%s2704_s14] sm:$0xff]  ;;  %588 = vmatpush.msrb.mxu1 %v2723_v5 }
  0x6b   : > { %3988 = vst [vmem:[#allocation69_spill] sm:$0xff] %v3118_v59  ;;  %v3175_v59 = vsub.f32 %v266_v19, %v3139_v21  ;;  %v3191_v19 = vand.u32 4294901760, %v3156_v27  ;;  %v3194_v36 = vsub.f32 %v265_v13, %v3158_v49  ;;  %v3197_v4 = vand.u32 4294901760, %v3165_v22  ;;  %690 = vmatpush.msrb.mxu3 %v3169_v23  ;;  %643 = vmatpush.msrb.mxu2 %v3158_v49 }
  0x6c   : > { %3989 = vst [vmem:[#allocation70_spill] sm:$0xff] %v3125_v38  ;;  %v712_v13 = vsub.f32 %v3137_v24, %v3172_v43  ;;  %v3213_v38 = vand.u32 4294901760, %v263_v44  ;;  %590 = vmatpush.msrb.mxu1 %v2734_v9  ;;  %573 = vmatpush.msrb.mxu0 %v3009_v53 }
  0x6d   : > { %3990 = vst [vmem:[#allocation71_spill] sm:$0xff] %v3132_v6  ;;  %v3188_v6 = vand.u32 4294901760, %v694_v34  ;;  %v262_v34 = vld [vmem:[%s3812_s1 + $0x88] sm:$0xff]  ;;  %v3227_v5 = vand.u32 4294901760, %v3194_v36  ;;  %v3231_v39 = vsub.f32 %v3165_v22, %v3197_v4  ;;  %645 = vmatpush.msrb.mxu2 %v3177_v33  ;;  %417 = vmatmul.f32.vlgmr.msra.gmra.mxu1 %v3197_v4 }
  0x6e   : > { %3991 = vst [vmem:[#allocation72_spill] sm:$0xff] %v3144_v37  ;;  %v3201_v37 = vand.u32 4294901760, %v700_v46  ;;  %v3220_v46 = vand.u32 4294901760, %v706_v3  ;;  %v261_v3 = vld [vmem:[%s3812_s1 + $0x80] sm:$0xff]  ;;  %592 = vmatpush.msrb.mxu1 %v2736_v10  ;;  %v3250_v9 = vsub.f32 %v263_v44, %v3213_v38  ;;  %577 = vmatpush.msrb.mxu0 %v3022_v54 }
  0x6f   : > { %3992 = vst [vmem:[#allocation73_spill] sm:$0xff] %v3151_v32  ;;  %v3211_v32 = vand.u32 4294901760, %v3175_v59  ;;  %696 = vmatpush.msrb.mxu3 %v3188_v6  ;;  %v3254_v58 = vand.u32 4294901760, %v261_v3  ;;  %v313_v10 = vand.u32 4294901760, %v3231_v39  ;;  %647 = vmatpush.msrb.mxu2 %v3213_v38 }
  0x70   : > { %3993 = vst [vmem:[#allocation74_spill] sm:$0xff] %v3165_v22  ;;  %v3247_v22 = vand.u32 4294901760, %v3216_v45  ;;  %594 = vmatpush.msrb.mxu1 %v2738_v11  ;;  %v3278_v11 = vand.u32 4294901760, %v3250_v9  ;;  %471 = vmatmul.f32.vlgmr.msra.gmra.mxu2 %v3231_v39 }
  0x71   : > { %3994 = vst [vmem:[#allocation75_spill] sm:$0xff] %v3169_v23  ;;  %v718_v23 = vsub.f32 %v3156_v27, %v3191_v19  ;;  %702 = vmatpush.msrb.mxu3 %v3201_v37  ;;  %v724_v51 = vsub.f32 %v3175_v59, %v3211_v32 }
  0x72   : > { %3995 = vst [vmem:[#allocation76_spill] sm:$0xff] %v3172_v43  ;;  %v3233_v43 = vand.u32 4294901760, %v262_v34  ;;  %596 = vmatpush.msrb.mxu1 %v2757_v17  ;;  %v3294_v17 = vand.u32 4294901760, %v3269_v0  ;;  %510 = vmatmul.f32.vlgmr.msra.gmra.mxu3 %v313_v10 }
  0x73   : > { %3996 = vst [vmem:[#allocation77_spill] sm:$0xff] %v3188_v6  ;;  %v3242_v6 = vand.u32 4294901760, %v712_v13  ;;  %708 = vmatpush.msrb.mxu3 %v3220_v46  ;;  %v3258_v13 = vand.u32 4294901760, %v718_v23  ;;  %v3273_v23 = vand.u32 4294901760, %v724_v51  ;;  %v314_v51 = vsub.f32 %v3231_v39, %v313_v10  ;;  %v4015_v39 = vld [vmem:[#allocation45_spill] sm:$0xff]  ;;  %v4017_v10 = vld [vmem:[#allocation60_spill] sm:$0xff] }
  0x74   : > { %3997 = vst [vmem:[#allocation78_spill] sm:$0xff] %v3191_v19  ;;  %v3264_v44 = vsub.f32 %v262_v34, %v3233_v43  ;;  %598 = vmatpush.msrb.mxu1 %v2782_v25  ;;  %v3283_v34 = vsub.f32 %v261_v3, %v3254_v58  ;;  %649 = vmatpush.msrb.mxu2 %v3233_v43 }
  0x75   : > { %3998 = vst [vmem:[#allocation79_spill] sm:$0xff] %v3194_v36  ;;  %714 = vmatpush.msrb.mxu3 %v3242_v6  ;;  %v315_v62 = vand.u32 4294901760, %v314_v51 }
  0x76   : > { %3999 = vst [vmem:[#allocation80_spill] sm:$0xff] %v3201_v37  ;;  %v730_v37 = vsub.f32 %v3194_v36, %v3227_v5  ;;  %v3291_v7 = vand.u32 4294901760, %v3264_v44  ;;  %600 = vmatpush.msrb.mxu1 %v2791_v28  ;;  %651 = vmatpush.msrb.mxu2 %v3254_v58 }
  0x77   : > { %4000 = vst [vmem:[#allocation81_spill] sm:$0xff] %v3211_v32  ;;  %720 = vmatpush.msrb.mxu3 %v3258_v13  ;;  %316 = vmatmul.f32.vlgmr.msra.gmra.mxu0 %v315_v62 }
  0x78   : > { %4001 = vst [vmem:[#allocation82_spill] sm:$0xff] %v3216_v45  ;;  %602 = vmatpush.msrb.mxu1 %v2811_v35  ;;  %764 = vmatpush.msra.mxu0 %v2955_v48 }
  0x79   : > { %4002 = vst [vmem:[#allocation83_spill] sm:$0xff] %v3220_v46  ;;  %v736_v46 = vsub.f32 %v3216_v45, %v3247_v22  ;;  %726 = vmatpush.msrb.mxu3 %v3273_v23  ;;  %858 = vmatpush.msra.mxu2 %v2999_v55 }
  0x7a   : > { %4003 = vst [vmem:[#allocation84_spill] sm:$0xff] %v3227_v5  ;;  %604 = vmatpush.msrb.mxu1 %v2828_v41  ;;  %767 = vmatpush.msra.mxu0 %v2978_v40 }
  0x7b   : > { %4004 = vst [vmem:[#allocation85_spill] sm:$0xff] %v3242_v6  ;;  %v3287_v6 = vand.u32 4294901760, %v730_v37  ;;  %v3300_v3 = vand.u32 4294901760, %v736_v46  ;;  %v742_v37 = vsub.f32 %v3250_v9, %v3278_v11  ;;  %v3315_v46 = vsub.f32 %v3269_v0, %v3294_v17 }
  0x7c   : > { %4005 = vst [vmem:[#allocation86_spill] sm:$0xff] %v3247_v22  ;;  %606 = vmatpush.msrb.mxu1 %v2856_v50  ;;  %770 = vmatpush.msra.mxu0 %v3012_v47 }
  0x7d   : > { %4006 = vst [vmem:[#allocation87_spill] sm:$0xff] %v3250_v9  ;;  %732 = vmatpush.msrb.mxu3 %v3287_v6  ;;  %v3321_v12 = vand.u32 4294901760, %v742_v37  ;;  %v3908_v53 = vand.u32 4294901760, %v3315_v46 }
  0x7e   : > { %4007 = vst [vmem:[#allocation88_spill] sm:$0xff] %v3258_v13  ;;  %v3307_v13 = vand.u32 4294901760, %v3283_v34  ;;  %608 = vmatpush.msrb.mxu1 %v2878_v57  ;;  %773 = vmatpush.msra.mxu0 %v3034_v20 }
  0x7f   : > { %4008 = vst [vmem:[#allocation89_spill] sm:$0xff] %v3264_v44  ;;  %738 = vmatpush.msrb.mxu3 %v3300_v3  ;;  %v655_v62 = vsub.f32 %v3315_v46, %v3908_v53  ;;  %v4018_v53 = vld [vmem:[#allocation62_spill] sm:$0xff]  ;;  %579 = vmatmul.f32.vlgmr.msrb.gmra.mxu0 %v3197_v4 }
  0x80   : > { %4009 = vst [vmem:[#allocation90_spill] sm:$0xff] %v3273_v23  ;;  %v748_v23 = vsub.f32 %v3264_v44, %v3291_v7  ;;  %v754_v51 = vsub.f32 %v3283_v34, %v3307_v13  ;;  %610 = vmatpush.msrb.mxu1 %v2897_v63  ;;  %776 = vmatpush.msra.mxu0 %v3057_v26 }
  0x81   : > { %4010 = vst [vmem:[#allocation91_spill] sm:$0xff] %v3278_v11  ;;  %744 = vmatpush.msrb.mxu3 %v3321_v12 }
  0x82   : > { %4011 = vst [vmem:[#allocation92_spill] sm:$0xff] %v3283_v34  ;;  %v3337_v37 = vand.u32 4294901760, %v754_v51  ;;  %612 = vmatpush.msrb.mxu1 %v4015_v39  ;;  %v656_v51 = vand.u32 4294901760, %v655_v62  ;;  %779 = vmatpush.msra.mxu0 %v3078_v14  ;;  %v4019_v62 = vld [vmem:[#allocation66_spill] sm:$0xff] }
  0x83   : > { %4012 = vst [vmem:[#allocation93_spill] sm:$0xff] %v3287_v6  ;;  %v3328_v6 = vand.u32 4294901760, %v748_v23  ;;  %v4016_v23 = vld [vmem:[#allocation57_spill] sm:$0xff] }
  0x84   : > { %4013 = vst [vmem:[#allocation94_spill] sm:$0xff] %v3291_v7  ;;  %862 = vmatpush.msra.mxu2 %v4016_v23  ;;  %614 = vmatpush.msrb.mxu1 %v2931_v30 }
  0x85   : > { %4014 = vst [vmem:[#allocation95_spill] sm:$0xff] %v3307_v13  ;;  %750 = vmatpush.msrb.mxu3 %v3328_v6  ;;  %657 = vmatmul.f32.vlgmr.msrb.gmra.mxu2 %v656_v51  ;;  %v4020_v51 = vld [vmem:[#allocation69_spill] sm:$0xff] }
  0x86   : > { %817 = vmatpush.msra.mxu1 %v2916_v8  ;;  %866 = vmatpush.msra.mxu2 %v4017_v10 }
  0x87   : > { %756 = vmatpush.msrb.mxu3 %v3337_v37  ;;  %782 = vmatpush.msra.mxu0 %v3085_v18  ;;  %v4021_v18 = vld [vmem:[#allocation70_spill] sm:$0xff] }
  0x88   : > { %819 = vmatpush.msra.mxu1 %v2933_v31  ;;  %870 = vmatpush.msra.mxu2 %v4018_v53 }
  0x89   : > { %925 = vmatpush.msra.mxu3 %v2916_v8  ;;  %616 = vmatmul.f32.vlgmr.msrb.gmra.mxu1 %v3197_v4  ;;  %v4022_v4 = vld [vmem:[#allocation72_spill] sm:$0xff] }
  0x8a   : > { %758 = vmatmul.f32.vlgmr.msrb.gmra.mxu3 %v3294_v17  ;;  %821 = vmatpush.msra.mxu1 %v2970_v60 }
  0x8b   : > { %927 = vmatpush.msra.mxu3 %v2933_v31  ;;  %874 = vmatpush.msra.mxu2 %v4019_v62 }
  0x8c   : > { %785 = vmatpush.msra.mxu0 %v3106_v56  ;;  %823 = vmatpush.msra.mxu1 %v2992_v2 }
  0x8d   : > { %929 = vmatpush.msra.mxu3 %v2970_v60  ;;  %878 = vmatpush.msra.mxu2 %v4020_v51  ;;  %v4023_v51 = vld [vmem:[#allocation76_spill] sm:$0xff] }
  0x8e   : > { %788 = vmatpush.msra.mxu0 %v3137_v24  ;;  %825 = vmatpush.msra.mxu1 %v3014_v29 }
  0x8f   : > { %931 = vmatpush.msra.mxu3 %v2992_v2  ;;  %882 = vmatpush.msra.mxu2 %v4021_v18 }
  0x90   : > { %791 = vmatpush.msra.mxu0 %v3156_v27  ;;  %827 = vmatpush.msra.mxu1 %v3036_v1 }
  0x91   : > { %933 = vmatpush.msra.mxu3 %v3014_v29  ;;  %886 = vmatpush.msra.mxu2 %v4022_v4 }
  0x92   : > { %794 = vmatpush.msra.mxu0 %v3175_v59  ;;  %829 = vmatpush.msra.mxu1 %v3045_v61 }
  0x93   : > { %935 = vmatpush.msra.mxu3 %v3036_v1  ;;  %890 = vmatpush.msra.mxu2 %v4023_v51  ;;  %v4063_v51 = vld [vmem:[#allocation61_spill] sm:$0xff] }
  0x94   : > { %797 = vmatpush.msra.mxu0 %v3194_v36  ;;  %831 = vmatpush.msra.mxu1 %v3063_v15  ;;  %v4038_v36 = vld [vmem:[#allocation19_spill] sm:$0xff] }
  0x95   : > { %937 = vmatpush.msra.mxu3 %v3045_v61  ;;  %894 = vmatpush.msra.mxu2 %v3191_v19  ;;  %v4037_v19 = vld [vmem:[#allocation17_spill] sm:$0xff] }
  0x96   : > { %800 = vmatpush.msra.mxu0 %v3216_v45  ;;  %833 = vmatpush.msra.mxu1 %v3099_v52  ;;  %v4035_v45 = vld [vmem:[#allocation18_spill] sm:$0xff] }
  0x97   : > { %939 = vmatpush.msra.mxu3 %v3063_v15  ;;  %898 = vmatpush.msra.mxu2 %v3211_v32  ;;  %v4033_v32 = vld [vmem:[#allocation28_spill] sm:$0xff] }
  0x98   : > { %803 = vmatpush.msra.mxu0 %v3250_v9  ;;  %835 = vmatpush.msra.mxu1 %v3120_v16  ;;  %v4031_v9 = vand.u32 4294901760, %v3315_v46 }
  0x99   : > { %941 = vmatpush.msra.mxu3 %v3099_v52  ;;  %902 = vmatpush.msra.mxu2 %v3227_v5  ;;  %v4024_v5 = vld [vmem:[#allocation8_spill] sm:$0xff] }
  0x9a   : > { %806 = vmatpush.msra.mxu0 %v3264_v44  ;;  %837 = vmatpush.msra.mxu1 %v3139_v21  ;;  %v4029_v44 = vld [vmem:[#allocation15_spill] sm:$0xff] }
  0x9b   : > { %943 = vmatpush.msra.mxu3 %v3120_v16  ;;  %906 = vmatpush.msra.mxu2 %v3247_v22  ;;  %v4025_v22 = vld [vmem:[#allocation9_spill] sm:$0xff] }
  0x9c   : > { %809 = vmatpush.msra.mxu0 %v3283_v34  ;;  %839 = vmatpush.msra.mxu1 %v3158_v49  ;;  %v4027_v34 = vld [vmem:[#allocation14_spill] sm:$0xff] }
  0x9d   : > { %945 = vmatpush.msra.mxu3 %v3139_v21  ;;  %910 = vmatpush.msra.mxu2 %v3278_v11  ;;  %v4026_v11 = vld [vmem:[#allocation10_spill] sm:$0xff] }
  0x9e   : > { %812 = vmatmul.f32.vlgmr.msra.gmra.mxu0 %v3315_v46  ;;  %841 = vmatpush.msra.mxu1 %v3177_v33  ;;  %v4039_v46 = vld [vmem:[#allocation31_spill] sm:$0xff] }
  0x9f   : > { %947 = vmatpush.msra.mxu3 %v3158_v49  ;;  %965 = vmatpush.msrb.mxu0 %v4024_v5 }
  0xa0   : > { %914 = vmatpush.msra.mxu2 %v3291_v7  ;;  %843 = vmatpush.msra.mxu1 %v3213_v38  ;;  %v4028_v7 = vld [vmem:[#allocation11_spill] sm:$0xff] }
  0xa1   : > { %949 = vmatpush.msra.mxu3 %v3177_v33  ;;  %967 = vmatpush.msrb.mxu0 %v4025_v22 }
  0xa2   : > { %918 = vmatpush.msra.mxu2 %v3307_v13  ;;  %845 = vmatpush.msra.mxu1 %v3233_v43  ;;  %v4030_v13 = vld [vmem:[#allocation12_spill] sm:$0xff] }
  0xa3   : > { %951 = vmatpush.msra.mxu3 %v3213_v38  ;;  %920 = vmatmul.f32.vlgmr.msra.gmra.mxu2 %v3294_v17 }
  0xa4   : > { %969 = vmatpush.msrb.mxu0 %v4026_v11  ;;  %1108 = vmatpush.msrb.mxu2 %v4027_v34  ;;  %v4032_v34 = vld [vmem:[#allocation16_spill] sm:$0xff] }
  0xa5   : > { %953 = vmatpush.msra.mxu3 %v3233_v43  ;;  %847 = vmatpush.msra.mxu1 %v3254_v58 }
  0xa6   : > { %971 = vmatpush.msrb.mxu0 %v4028_v7  ;;  %1111 = vmatpush.msrb.mxu2 %v4029_v44  ;;  %v4036_v44 = vld [vmem:[#allocation29_spill] sm:$0xff] }
  0xa7   : > { %955 = vmatpush.msra.mxu3 %v3254_v58  ;;  %851 = vmatmul.f32.vlgmr.msra.gmra.mxu1 %v4031_v9  ;;  %v4040_v9 = vld [vmem:[#allocation20_spill] sm:$0xff] }
  0xa8   : > { %957 = vmatmul.f32.vlgmr.msra.gmra.mxu3 %v3294_v17  ;;  %973 = vmatpush.msrb.mxu0 %v4030_v13  ;;  %v4034_v17 = vld [vmem:[#allocation13_spill] sm:$0xff] }
  0xa9   : > { %1161 = vmatpush.msrb.mxu3 %v4024_v5  ;;  %1114 = vmatpush.msrb.mxu2 %v4032_v34  ;;  %v4043_v34 = vld [vmem:[#allocation38_spill] sm:$0xff] }
  0xaa   : > { %1010 = vmatpush.msrb.mxu1 %v4033_v32  ;;  %975 = vmatpush.msrb.mxu0 %v4034_v17  ;;  %v4041_v32 = vld [vmem:[#allocation34_spill] sm:$0xff] }
  0xab   : > { %1163 = vmatpush.msrb.mxu3 %v4025_v22  ;;  %1117 = vmatpush.msrb.mxu2 %v4035_v45  ;;  %v4042_v45 = vld [vmem:[#allocation25_spill] sm:$0xff] }
  0xac   : > { %1016 = vmatpush.msrb.mxu1 %v4036_v44  ;;  %977 = vmatpush.msrb.mxu0 %v4037_v19  ;;  %v4045_v44 = vld [vmem:[#allocation40_spill] sm:$0xff] }
  0xad   : > { %1165 = vmatpush.msrb.mxu3 %v4026_v11  ;;  %1120 = vmatpush.msrb.mxu2 %v4038_v36  ;;  %v4044_v36 = vld [vmem:[#allocation30_spill] sm:$0xff] }
  0xae   : > { %1022 = vmatpush.msrb.mxu1 %v4039_v46  ;;  %979 = vmatpush.msrb.mxu0 %v2782_v25  ;;  %v4046_v46 = vld [vmem:[#allocation33_spill] sm:$0xff] }
  0xaf   : > { %1167 = vmatpush.msrb.mxu3 %v4028_v7  ;;  %1123 = vmatpush.msrb.mxu2 %v4040_v9  ;;  %v4047_v9 = vld [vmem:[#allocation44_spill] sm:$0xff] }
  0xb0   : > { %1028 = vmatpush.msrb.mxu1 %v4041_v32  ;;  %981 = vmatpush.msrb.mxu0 %v2791_v28  ;;  %v4048_v32 = vld [vmem:[#allocation36_spill] sm:$0xff] }
  0xb1   : > { %1169 = vmatpush.msrb.mxu3 %v4030_v13  ;;  %1126 = vmatpush.msrb.mxu2 %v4042_v45  ;;  %v4049_v45 = vld [vmem:[#allocation47_spill] sm:$0xff] }
  0xb2   : > { %1034 = vmatpush.msrb.mxu1 %v4043_v34  ;;  %983 = vmatpush.msrb.mxu0 %v2811_v35  ;;  %v4050_v34 = vld [vmem:[#allocation37_spill] sm:$0xff] }
  0xb3   : > { %1171 = vmatpush.msrb.mxu3 %v4034_v17  ;;  %1129 = vmatpush.msrb.mxu2 %v4044_v36  ;;  %v4051_v36 = vld [vmem:[#allocation49_spill] sm:$0xff] }
  0xb4   : > { %1040 = vmatpush.msrb.mxu1 %v4045_v44  ;;  %985 = vmatpush.msrb.mxu0 %v2828_v41  ;;  %v4052_v44 = vld [vmem:[#allocation42_spill] sm:$0xff] }
  0xb5   : > { %1173 = vmatpush.msrb.mxu3 %v4037_v19  ;;  %1132 = vmatpush.msrb.mxu2 %v4046_v46  ;;  %v4053_v46 = vld [vmem:[#allocation53_spill] sm:$0xff] }
  0xb6   : > { %1046 = vmatpush.msrb.mxu1 %v4047_v9  ;;  %987 = vmatpush.msrb.mxu0 %v2856_v50  ;;  %v4054_v9 = vld [vmem:[#allocation46_spill] sm:$0xff] }
  0xb7   : > { %1175 = vmatpush.msrb.mxu3 %v2782_v25  ;;  %1135 = vmatpush.msrb.mxu2 %v4048_v32  ;;  %v4055_v32 = vld [vmem:[#allocation55_spill] sm:$0xff] }
  0xb8   : > { %1052 = vmatpush.msrb.mxu1 %v4049_v45  ;;  %989 = vmatpush.msrb.mxu0 %v2878_v57  ;;  %v4056_v45 = vld [vmem:[#allocation48_spill] sm:$0xff] }
  0xb9   : > { %1177 = vmatpush.msrb.mxu3 %v2791_v28  ;;  %1138 = vmatpush.msrb.mxu2 %v4050_v34  ;;  %v4057_v34 = vld [vmem:[#allocation58_spill] sm:$0xff] }
  0xba   : > { %1058 = vmatpush.msrb.mxu1 %v4051_v36  ;;  %991 = vmatpush.msrb.mxu0 %v2897_v63  ;;  %v4058_v36 = vld [vmem:[#allocation21_spill] sm:$0xff] }
  0xbb   : > { %1179 = vmatpush.msrb.mxu3 %v2811_v35  ;;  %1141 = vmatpush.msrb.mxu2 %v4052_v44  ;;  %v4059_v44 = vld [vmem:[#allocation51_spill] sm:$0xff] }
  0xbc   : > { %1064 = vmatpush.msrb.mxu1 %v4053_v46  ;;  %993 = vmatpush.msrb.mxu0 %v4015_v39  ;;  %v4060_v46 = vld [vmem:[#allocation59_spill] sm:$0xff] }
  0xbd   : > { %1181 = vmatpush.msrb.mxu3 %v2828_v41  ;;  %1144 = vmatpush.msrb.mxu2 %v4054_v9  ;;  %v4061_v9 = vld [vmem:[#allocation22_spill] sm:$0xff] }
  0xbe   : > { %1070 = vmatpush.msrb.mxu1 %v4055_v32  ;;  %995 = vmatpush.msrb.mxu0 %v2931_v30  ;;  %v4062_v32 = vld [vmem:[#allocation52_spill] sm:$0xff] }
  0xbf   : > { %1183 = vmatpush.msrb.mxu3 %v2856_v50  ;;  %1147 = vmatpush.msrb.mxu2 %v4056_v45  ;;  %v4064_v45 = vld [vmem:[#allocation23_spill] sm:$0xff] }
  0xc0   : > { %1076 = vmatpush.msrb.mxu1 %v4057_v34  ;;  %1202 = vmatpush.msra.mxu0 %v4058_v36  ;;  %v4065_v34 = vld [vmem:[#allocation65_spill] sm:$0xff]  ;;  %v4066_v36 = vld [vmem:[#allocation24_spill] sm:$0xff] }
  0xc1   : > { %1185 = vmatpush.msrb.mxu3 %v2878_v57  ;;  %1150 = vmatpush.msrb.mxu2 %v4059_v44  ;;  %v4067_v44 = vld [vmem:[#allocation63_spill] sm:$0xff] }
  0xc2   : > { %1082 = vmatpush.msrb.mxu1 %v4060_v46  ;;  %1206 = vmatpush.msra.mxu0 %v4061_v9  ;;  %v4068_v46 = vld [vmem:[#allocation68_spill] sm:$0xff]  ;;  %v4069_v9 = vld [vmem:[#allocation26_spill] sm:$0xff] }
  0xc3   : > { %1187 = vmatpush.msrb.mxu3 %v2897_v63  ;;  %1153 = vmatpush.msrb.mxu2 %v4062_v32 }
  0xc4   : > { %1088 = vmatpush.msrb.mxu1 %v4063_v51  ;;  %1210 = vmatpush.msra.mxu0 %v4064_v45  ;;  %v4070_v51 = vld [vmem:[#allocation74_spill] sm:$0xff]  ;;  %v4071_v45 = vld [vmem:[#allocation67_spill] sm:$0xff] }
  0xc5   : > { %1189 = vmatpush.msrb.mxu3 %v4015_v39  ;;  %1306 = vmatpush.msra.mxu2 %v2916_v8  ;;  %v962_v32 = vmul.f32 %v4070_v51, %v4070_v51  ;;  %v4078_v51 = vld [vmem:[#allocation39_spill] sm:$0xff] }
  0xc6   : > { %1094 = vmatpush.msrb.mxu1 %v4065_v34  ;;  %1214 = vmatpush.msra.mxu0 %v4066_v36  ;;  %v4072_v34 = vld [vmem:[#allocation27_spill] sm:$0xff] }
  0xc7   : > { %1191 = vmatpush.msrb.mxu3 %v2931_v30  ;;  %1308 = vmatpush.msra.mxu2 %v2933_v31  ;;  %v4073_v36 = vld [vmem:[#allocation71_spill] sm:$0xff] }
  0xc8   : > { %1100 = vmatpush.msrb.mxu1 %v4068_v46  ;;  %1218 = vmatpush.msra.mxu0 %v4069_v9  ;;  %v4075_v46 = vld [vmem:[#allocation73_spill] sm:$0xff]  ;;  %v4076_v9 = vld [vmem:[#allocation35_spill] sm:$0xff] }
  0xc9   : > { %1351 = vmatpush.msra.mxu3 %v4067_v44  ;;  %1310 = vmatpush.msra.mxu2 %v2970_v60  ;;  %v4074_v44 = vld [vmem:[#allocation32_spill] sm:$0xff] }
  0xca   : > { %1269 = vmatpush.msra.mxu1 %v4024_v5  ;;  %1222 = vmatpush.msra.mxu0 %v4072_v34  ;;  %v3501_v5 = vand.u32 4294901760, %v962_v32  ;;  %v4080_v34 = vld [vmem:[#allocation41_spill] sm:$0xff] }
  0xcb   : > { %1357 = vmatpush.msra.mxu3 %v4071_v45  ;;  %1312 = vmatpush.msra.mxu2 %v2992_v2  ;;  %v4079_v45 = vld [vmem:[#allocation77_spill] sm:$0xff] }
  0xcc   : > { %1271 = vmatpush.msra.mxu1 %v4025_v22  ;;  %1226 = vmatpush.msra.mxu0 %v4074_v44  ;;  %v4077_v22 = vld [vmem:[#allocation75_spill] sm:$0xff] }
  0xcd   : > { %1363 = vmatpush.msra.mxu3 %v4073_v36  ;;  %1314 = vmatpush.msra.mxu2 %v3014_v29  ;;  %v4082_v36 = vld [vmem:[#allocation43_spill] sm:$0xff] }
  0xce   : > { %1273 = vmatpush.msra.mxu1 %v4026_v11  ;;  %1230 = vmatpush.msra.mxu0 %v4076_v9  ;;  %v997_v11 = vsub.f32 %v962_v32, %v3501_v5  ;;  %v4083_v32 = vld [vmem:[#allocation83_spill] sm:$0xff] }
  0xcf   : > { %1369 = vmatpush.msra.mxu3 %v4075_v46  ;;  %1316 = vmatpush.msra.mxu2 %v3036_v1  ;;  %v4085_v46 = vld [vmem:[#allocation50_spill] sm:$0xff] }
  0xd0   : > { %1275 = vmatpush.msra.mxu1 %v4028_v7  ;;  %1234 = vmatpush.msra.mxu0 %v4078_v51  ;;  %v4081_v7 = vld [vmem:[#allocation80_spill] sm:$0xff]  ;;  %v998_v44 = vand.u32 4294901760, %v997_v11 }
  0xd1   : > { %1375 = vmatpush.msra.mxu3 %v4077_v22  ;;  %1318 = vmatpush.msra.mxu2 %v3045_v61  ;;  %v4087_v22 = vld [vmem:[#allocation54_spill] sm:$0xff] }
  0xd2   : > { %1277 = vmatpush.msra.mxu1 %v4030_v13  ;;  %1238 = vmatpush.msra.mxu0 %v4080_v34  ;;  %v963_v13 = vmul.f32 %v3269_v0, %v3269_v0  ;;  %v4086_v0 = vld [vmem:[#allocation88_spill] sm:$0xff] }
  0xd3   : > { %1381 = vmatpush.msra.mxu3 %v4079_v45  ;;  %1320 = vmatpush.msra.mxu2 %v3063_v15  ;;  %v4090_v45 = vld [vmem:[#allocation93_spill] sm:$0xff] }
  0xd4   : > { %1279 = vmatpush.msra.mxu1 %v4034_v17  ;;  %1242 = vmatpush.msra.mxu0 %v4082_v36  ;;  %v4084_v17 = vld [vmem:[#allocation85_spill] sm:$0xff]  ;;  %v3530_v9 = vand.u32 4294901760, %v963_v13 }
  0xd5   : > { %1387 = vmatpush.msra.mxu3 %v4081_v7  ;;  %1322 = vmatpush.msra.mxu2 %v3099_v52 }
  0xd6   : > { %1281 = vmatpush.msra.mxu1 %v4037_v19  ;;  %1246 = vmatpush.msra.mxu0 %v2945_v42  ;;  %v999_v19 = vsub.f32 %v997_v11, %v998_v44  ;;  %v4089_v42 = vld [vmem:[#allocation56_spill] sm:$0xff]  ;;  %v3541_v51 = vsub.f32 %v963_v13, %v3530_v9 }
  0xd7   : > { %1393 = vmatpush.msra.mxu3 %v4083_v32  ;;  %1324 = vmatpush.msra.mxu2 %v3120_v16  ;;  %v277_v32 = vld [vmem:[%s3813_s2] sm:$0xff] }
  0xd8   : > { %1283 = vmatpush.msra.mxu1 %v2782_v25  ;;  %1250 = vmatpush.msra.mxu0 %v4085_v46  ;;  %v4088_v25 = vld [vmem:[#allocation90_spill] sm:$0xff]  ;;  %v3638_v46 = vand.u32 4294901760, %v277_v32 }
  0xd9   : > { %1399 = vmatpush.msra.mxu3 %v4084_v17  ;;  %1326 = vmatpush.msra.mxu2 %v3139_v21 }
  0xda   : > { %1285 = vmatpush.msra.mxu1 %v2791_v28  ;;  %1254 = vmatpush.msra.mxu0 %v4087_v22  ;;  %v1000_v28 = vand.u32 4294901760, %v999_v19 }
  0xdb   : > { %1405 = vmatpush.msra.mxu3 %v4086_v0  ;;  %1328 = vmatpush.msra.mxu2 %v3158_v49  ;;  %v3641_v0 = vsub.f32 %v277_v32, %v3638_v46  ;;  %v2265_v32 = vld [vmem:[%s3814_s3 + $0x38] sm:$0xff] }
  0xdc   : > { %1287 = vmatpush.msra.mxu1 %v2811_v35  ;;  %1258 = vmatpush.msra.mxu0 %v4089_v42  ;;  %v1339_v35 = vand.u32 4294901760, %v3541_v51 }
  0xdd   : > { %1411 = vmatpush.msra.mxu3 %v4088_v25  ;;  %1330 = vmatpush.msra.mxu2 %v3177_v33  ;;  %v3645_v25 = vand.u32 4294901760, %v3641_v0 }
  0xde   : > { %1289 = vmatpush.msra.mxu1 %v2828_v41  ;;  %1262 = vmatpush.msra.mxu0 %v3022_v54  ;;  %v1340_v41 = vsub.f32 %v3541_v51, %v1339_v35 }
  0xdf   : > { %1417 = vmatpush.msra.mxu3 %v4090_v45  ;;  %1332 = vmatpush.msra.mxu2 %v3213_v38  ;;  %v1711_v45 = vsub.f32 %v3641_v0, %v3645_v25 }
  0xe0   : > { %1291 = vmatpush.msra.mxu1 %v2856_v50  ;;  %1001 = vmatmul.f32.vlgmr.msrb.gmra.mxu0 %v1000_v28  ;;  %v4093_v50 = vld [vmem:[#allocation76_spill] sm:$0xff] }
  0xe1   : > { %1423 = vmatpush.msra.mxu3 %v3300_v3  ;;  %1449 = vmatpush.msrb.mxu0 %v2955_v48 }
  0xe2   : > { %1293 = vmatpush.msra.mxu1 %v2878_v57  ;;  %1334 = vmatpush.msra.mxu2 %v3233_v43  ;;  %v4099_v57 = vld [vmem:[#allocation84_spill] sm:$0xff] }
  0xe3   : > { %1429 = vmatpush.msra.mxu3 %v3321_v12  ;;  %1156 = vmatmul.f32.vlgmr.msrb.gmra.mxu2 %v997_v11 }
  0xe4   : > { %1452 = vmatpush.msrb.mxu0 %v2978_v40  ;;  %1295 = vmatpush.msra.mxu1 %v2897_v63  ;;  %v1341_v40 = vand.u32 4294901760, %v1340_v41  ;;  %v4102_v63 = vld [vmem:[#allocation92_spill] sm:$0xff]  ;;  %v278_v41 = vld [vmem:[%s3813_s2 + $0x8] sm:$0xff] }
  0xe5   : > { %1336 = vmatpush.msra.mxu2 %v3254_v58  ;;  %1435 = vmatpush.msra.mxu3 %v3328_v6 }
  0xe6   : > { %1195 = vmatmul.f32.vlgmr.msrb.gmra.mxu3 %v998_v44  ;;  %1455 = vmatpush.msrb.mxu0 %v3012_v47 }
  0xe7   : > { %1543 = vmatpush.msrb.mxu2 %v2999_v55  ;;  %1297 = vmatpush.msra.mxu1 %v4015_v39  ;;  %v4098_v55 = vld [vmem:[#allocation87_spill] sm:$0xff] }
  0xe8   : > { %1441 = vmatpush.msra.mxu3 %v3337_v37  ;;  %1102 = vmatmul.f32.vlgmr.msrb.gmra.mxu1 %v3501_v5 }
  0xe9   : > { %1458 = vmatpush.msrb.mxu0 %v3034_v20  ;;  %1547 = vmatpush.msrb.mxu2 %v4016_v23  ;;  %v4091_v20 = vld [vmem:[#allocation64_spill] sm:$0xff] }
  0xea   : > { %1610 = vmatpush.msrb.mxu3 %v2916_v8  ;;  %1299 = vmatpush.msra.mxu1 %v2931_v30 }
  0xeb   : > { %1461 = vmatpush.msrb.mxu0 %v3057_v26  ;;  %1551 = vmatpush.msrb.mxu2 %v4017_v10 }
  0xec   : > { %1502 = vmatpush.msrb.mxu1 %v2916_v8  ;;  %1612 = vmatpush.msrb.mxu3 %v2933_v31  ;;  %v4104_v8 = vld [vmem:[#allocation94_spill] sm:$0xff] }
  0xed   : > { %1342 = vmatmul.f32.vlgmr.msra.gmra.mxu2 %v1341_v40  ;;  %1464 = vmatpush.msrb.mxu0 %v3078_v14  ;;  %v4092_v14 = vld [vmem:[#allocation69_spill] sm:$0xff]  ;;  %v1712_v40 = vand.u32 4294901760, %v1711_v45  ;;  %v2283_v45 = vld [vmem:[%s3814_s3 + $0xc8] sm:$0xff] }
  0xee   : > { %1504 = vmatpush.msrb.mxu1 %v2933_v31  ;;  %1555 = vmatpush.msrb.mxu2 %v4018_v53  ;;  %v4097_v53 = vld [vmem:[#allocation81_spill] sm:$0xff] }
  0xef   : > { %1614 = vmatpush.msrb.mxu3 %v2970_v60  ;;  %1264 = vmatmul.f32.vlgmr.msra.gmra.mxu0 %v3501_v5 }
  0xf0   : > { %1443 = vmatmul.f32.vlgmr.msra.gmra.mxu3 %v3530_v9  ;;  %1467 = vmatpush.msrb.mxu0 %v4091_v20  ;;  %v3653_v20 = vand.u32 4294901760, %v278_v41 }
  0xf1   : > { %1506 = vmatpush.msrb.mxu1 %v2970_v60  ;;  %1559 = vmatpush.msrb.mxu2 %v4019_v62  ;;  %v4101_v60 = vld [vmem:[#allocation86_spill] sm:$0xff] }
  0xf2   : > { %1616 = vmatpush.msrb.mxu3 %v2992_v2  ;;  %1301 = vmatmul.f32.vlgmr.msra.gmra.mxu1 %v3501_v5 }
  0xf3   : > { %1470 = vmatpush.msrb.mxu0 %v3106_v56  ;;  %1508 = vmatpush.msrb.mxu1 %v2992_v2 }
  0xf4   : > { %1563 = vmatpush.msrb.mxu2 %v4092_v14  ;;  %1618 = vmatpush.msrb.mxu3 %v3014_v29  ;;  %v317_v12 = vpop.f32.mrf.mxu0 }
  0xf5   : > { %1473 = vmatpush.msrb.mxu0 %v3137_v24  ;;  %1510 = vmatpush.msrb.mxu1 %v3014_v29  ;;  %v4094_v24 = vld [vmem:[#allocation79_spill] sm:$0xff]  ;;  %v4095_v29 = vld [vmem:[#allocation78_spill] sm:$0xff]  ;;  %v511_v26 = vpop.f32.mrf.mxu3 }
  0xf6   : > { %1567 = vmatpush.msrb.mxu2 %v4021_v18  ;;  %1620 = vmatpush.msrb.mxu3 %v3036_v1  ;;  %v472_v18 = vpop.f32.mrf.mxu2 }
  0xf7   : > { %1476 = vmatpush.msrb.mxu0 %v3156_v27  ;;  %1512 = vmatpush.msrb.mxu1 %v3036_v1  ;;  %v4096_v27 = vld [vmem:[#allocation82_spill] sm:$0xff]  ;;  %v4103_v1 = vld [vmem:[#allocation91_spill] sm:$0xff] }
  0xf8   : > { %1571 = vmatpush.msrb.mxu2 %v4022_v4  ;;  %1622 = vmatpush.msrb.mxu3 %v3045_v61 }
  0xf9   : > { %1479 = vmatpush.msrb.mxu0 %v3175_v59  ;;  %1514 = vmatpush.msrb.mxu1 %v3045_v61 }
  0xfa   : > { %1575 = vmatpush.msrb.mxu2 %v4093_v50  ;;  %1624 = vmatpush.msrb.mxu3 %v3063_v15 }
  0xfb   : > { %1482 = vmatpush.msrb.mxu0 %v4094_v24  ;;  %1516 = vmatpush.msrb.mxu1 %v3063_v15  ;;  %v4100_v15 = vld [vmem:[#allocation89_spill] sm:$0xff] }
  0xfc   : > { %1579 = vmatpush.msrb.mxu2 %v4095_v29  ;;  %1626 = vmatpush.msrb.mxu3 %v3099_v52  ;;  %v580_v31 = vpop.f32.mrf.mxu0  ;;  %v1855_v29 = vsub.f32 %v278_v41, %v3653_v20  ;;  %v2282_v41 = vld [vmem:[%s3814_s3 + $0xc0] sm:$0xff] }
  0xfd   : > { %1485 = vmatpush.msrb.mxu0 %v4096_v27  ;;  %1518 = vmatpush.msrb.mxu1 %v3099_v52 }
  0xfe   : > { %1583 = vmatpush.msrb.mxu2 %v4097_v53  ;;  %1628 = vmatpush.msrb.mxu3 %v3120_v16 }
  0xff   : > { %1488 = vmatpush.msrb.mxu0 %v4098_v55  ;;  %1520 = vmatpush.msrb.mxu1 %v3120_v16 }
 0x100   : > { %1587 = vmatpush.msrb.mxu2 %v4099_v57  ;;  %1630 = vmatpush.msrb.mxu3 %v3139_v21 }
 0x101   : > { %1491 = vmatpush.msrb.mxu0 %v4100_v15  ;;  %1522 = vmatpush.msrb.mxu1 %v3139_v21  ;;  %v4105_v21 = vld [vmem:[#allocation95_spill] sm:$0xff] }
 0x102   : > { %1591 = vmatpush.msrb.mxu2 %v4101_v60  ;;  %1632 = vmatpush.msrb.mxu3 %v3158_v49 }
 0x103   : > { %1494 = vmatpush.msrb.mxu0 %v4102_v63  ;;  %1524 = vmatpush.msrb.mxu1 %v3158_v49 }
 0x104   : > { %1595 = vmatpush.msrb.mxu2 %v4103_v1  ;;  %1634 = vmatpush.msrb.mxu3 %v3177_v33 }
 0x105   : > { %1497 = vmatmul.f32.vlgmr.msrb.gmra.mxu0 %v3541_v51  ;;  %1526 = vmatpush.msrb.mxu1 %v3177_v33  ;;  %v418_v33 = vpop.f32.mrf.mxu1 }
 0x106   : > { %1599 = vmatpush.msrb.mxu2 %v4104_v8  ;;  %1636 = vmatpush.msrb.mxu3 %v3213_v38  ;;  %v419_v61 = vadd.f32 %v418_v33, %v317_v12 }
 0x107   : > { %1528 = vmatpush.msrb.mxu1 %v3213_v38  ;;  %1882 = vmatpush.msra.mxu0 %v1855_v29 }
 0x108   : > { %1603 = vmatpush.msrb.mxu2 %v4105_v21  ;;  %1638 = vmatpush.msrb.mxu3 %v3233_v43  ;;  %v658_v48 = vpop.f32.mrf.mxu2  ;;  %v473_v47 = vadd.f32 %v472_v18, %v419_v61 }
 0x109   : > { %1605 = vmatmul.f32.vlgmr.msrb.gmra.mxu2 %v3530_v9  ;;  %1530 = vmatpush.msrb.mxu1 %v3233_v43 }
 0x10a   : > { %1640 = vmatpush.msrb.mxu3 %v3254_v58  ;;  %v512_v49 = vadd.f32 %v511_v26, %v473_v47  ;;  %1683 = vmatpush.msra.mxu2 %v3638_v46 }
 0x10b   : > { %1642 = vmatmul.f32.vlgmr.msrb.gmra.mxu3 %v3530_v9  ;;  %1532 = vmatpush.msrb.mxu1 %v3254_v58 }
 0x10c   : > { %1536 = vmatmul.f32.vlgmr.msrb.gmra.mxu1 %v1339_v35  ;;  %v581_v43 = vadd.f32 %v580_v31, %v512_v49  ;;  %1736 = vmatpush.msrb.mxu2 %v3641_v0 }
 0x10d   : > { %v617_v30 = vpop.f32.mrf.mxu1  ;;  %v759_v54 = vpop.f32.mrf.mxu3  ;;  %1713 = vmatpush.msra.mxu3 %v1712_v40  ;;  %1905 = vmatpush.msra.mxu1 %v3653_v20 }
 0x10e   : > { %v618_v39 = vadd.f32 %v617_v30, %v581_v43  ;;  %1980 = vmatpush.msrb.mxu0 %v3638_v46 }
 0x10f   : > { %1759 = vmatpush.msrb.mxu3 %v3638_v46  ;;  %2010 = vmatpush.msrb.mxu1 %v1712_v40  ;;  %v2259_v40 = vld [vmem:[%s3814_s3 + $0x8] sm:$0xff] }
 0x110   : > { %v659_v62 = vadd.f32 %v658_v48, %v618_v39  ;;  %v2272_v39 = vld [vmem:[%s3814_s3 + $0x70] sm:$0xff] }
 0x112   : > { %v760_v11 = vadd.f32 %v759_v54, %v659_v62  ;;  %v1856_v54 = vand.u32 4294901760, %v1855_v29  ;;  %v2270_v62 = vld [vmem:[%s3814_s3 + $0x60] sm:$0xff] }
 0x114   : > { %v1857_v47 = vsub.f32 %v1855_v29, %v1856_v54 }
 0x11b   : > { %v813_v2 = vpop.f32.mrf.mxu0 }
 0x11c   : > { %v814_v7 = vadd.f32 %v813_v2, %v760_v11  ;;  %v2267_v11 = vld [vmem:[%s3814_s3 + $0x48] sm:$0xff] }
 0x124   : > { %v852_v59 = vpop.f32.mrf.mxu1 }
 0x125   : > { %v853_v44 = vadd.f32 %v852_v59, %v814_v7 }
 0x126   : > { %v921_v6 = vpop.f32.mrf.mxu2 }
 0x127   : > { %v922_v19 = vadd.f32 %v921_v6, %v853_v44  ;;  %v2266_v44 = vld [vmem:[%s3814_s3 + $0x40] sm:$0xff] }
 0x12b   : > { %v958_v56 = vpop.f32.mrf.mxu3 }
 0x12c   : > { %v959_v28 = vadd.f32 %v958_v56, %v922_v19  ;;  %v2286_v19 = vld [vmem:[%s3814_s3 + $0xe0] sm:$0xff] }
 0x12e   : > { %v961_v50 = vmul.f32 0.015625, %v959_v28  ;;  %v2284_v28 = vld [vmem:[%s3814_s3 + $0xd0] sm:$0xff] }
 0x130   : > { %v1647_v55 = vmul.f32 %v961_v50, %v961_v50  ;;  %v1661_v26 = vsub.f32 0.0, %v961_v50  ;;  %v2258_v50 = vld [vmem:[%s3814_s3] sm:$0xff] }
 0x15d   : > { %v1002_v58 = vpop.f32.mrf.mxu0 }
 0x165   : > { %v1103_v52 = vpop.f32.mrf.mxu1 }
 0x166   : > { %v1104_v16 = vadd.f32 %v1103_v52, %v1002_v58  ;;  %v1157_v38 = vpop.f32.mrf.mxu2 }
 0x168   : > { %v1158_v3 = vadd.f32 %v1157_v38, %v1104_v16  ;;  %v1858_v16 = vand.u32 4294901760, %v1857_v47 }
 0x169   : > { %v1196_v37 = vpop.f32.mrf.mxu3 }
 0x16a   : > { %v1197_v23 = vadd.f32 %v1196_v37, %v1158_v3  ;;  %v2273_v37 = vld [vmem:[%s3814_s3 + $0x78] sm:$0xff] }
 0x16c   : > { %v1265_v10 = vpop.f32.mrf.mxu0 }
 0x16d   : > { %v1266_v4 = vadd.f32 %v1265_v10, %v1197_v23  ;;  %v2271_v23 = vld [vmem:[%s3814_s3 + $0x68] sm:$0xff] }
 0x16f   : > { %v1302_v5 = vpop.f32.mrf.mxu1 }
 0x170   : > { %v1303_v34 = vadd.f32 %v1302_v5, %v1266_v4  ;;  %v1343_v36 = vpop.f32.mrf.mxu2  ;;  %v2269_v4 = vld [vmem:[%s3814_s3 + $0x58] sm:$0xff]  ;;  %v2268_v5 = vld [vmem:[%s3814_s3 + $0x50] sm:$0xff] }
 0x172   : > { %v1344_v13 = vadd.f32 %v1343_v36, %v1303_v34  ;;  %v2289_v34 = vld [vmem:[%s3814_s3 + $0xf8] sm:$0xff] }
 0x173   : > { %v1444_v17 = vpop.f32.mrf.mxu3 }
 0x174   : > { %v1445_v22 = vadd.f32 %v1444_v17, %v1344_v13  ;;  %v2288_v13 = vld [vmem:[%s3814_s3 + $0xf0] sm:$0xff]  ;;  %v2287_v17 = vld [vmem:[%s3814_s3 + $0xe8] sm:$0xff] }
 0x182   : > { %v1498_v9 = vpop.f32.mrf.mxu0 }
 0x183   : > { %v1499_v42 = vadd.f32 %v1498_v9, %v1445_v22  ;;  %v2263_v9 = vld [vmem:[%s3814_s3 + $0x28] sm:$0xff] }
 0x189   : > { %v1537_v51 = vpop.f32.mrf.mxu1 }
 0x18a   : > { %v1538_v35 = vadd.f32 %v1537_v51, %v1499_v42  ;;  %v2262_v42 = vld [vmem:[%s3814_s3 + $0x20] sm:$0xff]  ;;  %v2261_v51 = vld [vmem:[%s3814_s3 + $0x18] sm:$0xff] }
 0x18c   : > { %v1606_v14 = vpop.f32.mrf.mxu2 }
 0x18d   : > { %v1607_v24 = vadd.f32 %v1606_v14, %v1538_v35  ;;  %v2260_v35 = vld [vmem:[%s3814_s3 + $0x10] sm:$0xff] }
 0x18e   : > { %v1643_v27 = vpop.f32.mrf.mxu3 }
 0x18f   : > { %v1644_v53 = vadd.f32 %v1643_v27, %v1607_v24  ;;  %v2280_v24 = vld [vmem:[%s3814_s3 + $0xb0] sm:$0xff]  ;;  %v2279_v27 = vld [vmem:[%s3814_s3 + $0xa8] sm:$0xff] }
 0x191   : > { %v1646_v57 = vmul.f32 0.015625, %v1644_v53  ;;  %v2278_v53 = vld [vmem:[%s3814_s3 + $0xa0] sm:$0xff] }
 0x193   : > { %v1648_v15 = vsub.f32 %v1646_v57, %v1647_v55  ;;  %v2277_v57 = vld [vmem:[%s3814_s3 + $0x98] sm:$0xff] }
 0x195   : > { %v1649_v60 = vmax.f32 %v1648_v15, 0.0 }
 0x197   : > { %v1650_v63 = vadd.f32 1e-05, %v1649_v60 }
 0x199   : > { %2482 = vrsqrt.f32 %v1650_v63  ;;  %vm1657_vm1 = vweird.f32 %v1650_v63 }
 0x19f   : > { %v2483_v1 = vpop.eup %2482 }
 0x1a0   : > { %v1652_v8 = vmul.f32 %v2483_v1, %v1650_v63  ;;  %vm1658_vm0 = vweird.f32 %v2483_v1  ;;  %v2276_v63 = vld [vmem:[%s3814_s3 + $0x90] sm:$0xff] }
 0x1a1   : > { %vm1659_vm3 = vmor %vm1657_vm1, %vm1658_vm0 }
 0x1a2   : > { %v1653_v21 = vmul.f32 %v2483_v1, %v1652_v8 }
 0x1a4   : > { %v1654_v33 = vmul.f32 0.5, %v1653_v21  ;;  %v2274_v21 = vld [vmem:[%s3814_s3 + $0x80] sm:$0xff] }
 0x1a6   : > { %v1655_v12 = vsub.f32 1.5, %v1654_v33 }
 0x1a8   : > { %v1656_v18 = vmul.f32 %v2483_v1, %v1655_v12 }
 0x1aa   : > { %v1660_v30 = vsel %vm1659_vm3, %v2483_v1, %v1656_v18  ;;  %v2275_v1 = vld [vmem:[%s3814_s3 + $0x88] sm:$0xff] }
 0x1ab   : > { %v1662_v31 = vmul.f32 %v1661_v26, %v1660_v30  ;;  %v1665_v48 = vsel %vm1663_vm2, %v1660_v30, 0 }
 0x1ac   : > { %v1684_v59 = vand.u32 4294901760, %v1665_v48 }
 0x1ad   : > { %v1962_v61 = vsel %vm1663_vm2, %v1662_v31, 0 }
 0x1ae   : > { %v1981_v2 = vand.u32 4294901760, %v1962_v61  ;;  %1715 = vmatmul.f32.vlgmr.msra.gmra.mxu3 %v1684_v59  ;;  %v1685_v6 = vsub.f32 %v1665_v48, %v1684_v59 }
 0x1af   : > { %1807 = vmatpush.msra.mxu3 %v3638_v46 }
 0x1b0   : > { %v1982_v56 = vsub.f32 %v1962_v61, %v1981_v2  ;;  %1885 = vmatmul.f32.vlgmr.msra.gmra.mxu0 %v1685_v6  ;;  %v1686_v52 = vand.u32 4294901760, %v1685_v6 }
 0x1b1   : > { %2082 = vmatpush.msra.mxu0 %v3645_v25 }
 0x1b2   : > { %1909 = vmatmul.f32.vlgmr.msra.gmra.mxu1 %v1686_v52  ;;  %v1687_v49 = vsub.f32 %v1685_v6, %v1686_v52  ;;  %v1983_v58 = vand.u32 4294901760, %v1982_v56 }
 0x1b3   : > { %2104 = vmatpush.msra.mxu1 %v3638_v46 }
 0x1b4   : > { %v1688_v38 = vand.u32 4294901760, %v1687_v49  ;;  %v1984_v43 = vsub.f32 %v1982_v56, %v1983_v58 }
 0x1b6   : > { %1689 = vmatmul.f32.vlgmr.msra.gmra.mxu2 %v1688_v38  ;;  %1763 = vmatmul.f32.vlgmr.msrb.gmra.mxu3 %v1686_v52  ;;  %v1985_v3 = vand.u32 4294901760, %v1984_v43 }
 0x1b7   : > { %1785 = vmatpush.msra.mxu2 %v3645_v25  ;;  %1859 = vmatpush.msrb.mxu3 %v1858_v16 }
 0x1b8   : > { %1986 = vmatmul.f32.vlgmr.msrb.gmra.mxu0 %v1985_v3 }
 0x1b9   : > { %2179 = vmatpush.msrb.mxu0 %v1855_v29 }
 0x1ba   : > { %2012 = vmatmul.f32.vlgmr.msrb.gmra.mxu1 %v1981_v2 }
 0x1bb   : > { %2202 = vmatpush.msrb.mxu1 %v3653_v20 }
 0x1be   : > { %1739 = vmatmul.f32.vlgmr.msrb.gmra.mxu2 %v1685_v6  ;;  %1809 = vmatmul.f32.vlgmr.msra.gmra.mxu3 %v1684_v59 }
 0x1bf   : > { %1829 = vmatpush.msrb.mxu2 %v3653_v20  ;;  %1953 = vmatpush.msra.mxu3 %v3653_v20 }
 0x1c0   : > { %2084 = vmatmul.f32.vlgmr.msra.gmra.mxu0 %v1981_v2 }
 0x1c1   : > { %2294 = vmatpush.msra.mxu0 %v2273_v37 }
 0x1c2   : > { %2106 = vmatmul.f32.vlgmr.msra.gmra.mxu1 %v1981_v2 }
 0x1c3   : > { %2295 = vmatpush.msra.mxu0 %v2272_v39  ;;  %2314 = vmatpush.msra.mxu1 %v2289_v34 }
 0x1c5   : > { %2296 = vmatpush.msra.mxu0 %v2271_v23  ;;  %2315 = vmatpush.msra.mxu1 %v2288_v13 }
 0x1c6   : > { %1787 = vmatmul.f32.vlgmr.msra.gmra.mxu2 %v1684_v59  ;;  %1861 = vmatmul.f32.vlgmr.msrb.gmra.mxu3 %v1684_v59 }
 0x1c7   : > { %1931 = vmatpush.msra.mxu2 %v1856_v54  ;;  %2056 = vmatpush.msrb.mxu3 %v3638_v46  ;;  %v2264_v46 = vld [vmem:[%s3814_s3 + $0x30] sm:$0xff] }
 0x1c8   : > { %2182 = vmatmul.f32.vlgmr.msrb.gmra.mxu0 %v1982_v56  ;;  %2316 = vmatpush.msra.mxu1 %v2287_v17  ;;  %v2485_v17 = vld [vmem:[%s2704_s14 + $0x8] sm:$0xff] }
 0x1c9   : > { %2297 = vmatpush.msra.mxu0 %v2270_v62 }
 0x1ca   : > { %2206 = vmatmul.f32.vlgmr.msrb.gmra.mxu1 %v1983_v58 }
 0x1cb   : > { %2298 = vmatpush.msra.mxu0 %v2269_v4  ;;  %2317 = vmatpush.msra.mxu1 %v2286_v19 }
 0x1cd   : > { %2299 = vmatpush.msra.mxu0 %v2268_v5 }
 0x1ce   : > { %1835 = vmatmul.f32.vlgmr.msrb.gmra.mxu2 %v1688_v38  ;;  %1955 = vmatmul.f32.vlgmr.msra.gmra.mxu3 %v1684_v59  ;;  %v2484_v38 = vld [vmem:[%s2704_s14] sm:$0xff]  ;;  %s2350_s14 = sshll.u32 %s2346_s11, 4  ;;  %s2351_s14 = int_to_ptr.hbm [resolvable:$true] %s2350_s14 }
 0x1cf   : > { %2033 = vmatpush.msrb.mxu2 %v3641_v0  ;;  %2156 = vmatpush.msra.mxu3 %v1858_v16  ;;  %v2285_v0 = vld [vmem:[%s3814_s3 + $0xd8] sm:$0xff]  ;;  %s2530_s15 = sshra.s32 %s2351_s14, 4  ;;  %s2531_s15 = int_to_ptr.hbm [resolvable:$true] %s2530_s15 }
 0x1d0   : > { %2300 = vmatpush.msra.mxu0 %v2267_v11  ;;  %2318 = vmatpush.msra.mxu1 %v2285_v0  ;;  %v2481_v0 = vld [vmem:[%s3815_s4] ss:$0 sm:$0xff]  ;;  %s2532_s16 = scalar_lea.hbm %s2531_s15, 8  ;;  %p2537_p0 = scmp.lt.s32.totalorder %s2531_s15, %s3816_s5 }
 0x1d1   : > { %p2533_p6 = scmp.ne.s32.totalorder %s2531_s15, %s2532_s16  ;;  %p2538_p1 = scmp.lt.s32.totalorder %s2536_s25, %s2532_s16 }
 0x1d2   : > { %2301 = vmatpush.msra.mxu0 %v2266_v44  ;;  %2319 = vmatpush.msra.mxu1 %v2284_v28 }
 0x1d3   : > { %p2534_p9 = pnand %p2533_p6, %p2664_p11  ;;  %p2539_p3 = por %p2538_p1, %p2537_p0 }
 0x1d4   : > { %2302 = vmatpush.msra.mxu0 %v2265_v32  ;;  %2320 = vmatpush.msra.mxu1 %v2283_v45 }
 0x1d5   : > { %p2535_p13 = pneg %p2534_p9 }
 0x1d6   : > { %1933 = vmatmul.f32.vlgmr.msra.gmra.mxu2 %v1684_v59  ;;  %2060 = vmatmul.f32.vlgmr.msrb.gmra.mxu3 %v1983_v58 }
 0x1d7   : > { %2126 = vmatpush.msra.mxu2 %v3653_v20  ;;  %2250 = vmatpush.msrb.mxu3 %v3653_v20  ;;  %v2281_v20 = vld [vmem:[%s3814_s3 + $0xb8] sm:$0xff]  ;;  %p2540_p4 = pnand %p2539_p3, %p2535_p13 }
 0x1d8   : > { %2303 = vmatpush.msra.mxu0 %v2264_v46  ;;  %2321 = vmatpush.msra.mxu1 %v2282_v41 }
 0x1da   : > { %2304 = vmatpush.msra.mxu0 %v2263_v9  ;;  %2322 = vmatpush.msra.mxu1 %v2281_v20 }
 0x1dc   : > { %2305 = vmatpush.msra.mxu0 %v2262_v42  ;;  %2323 = vmatpush.msra.mxu1 %v2280_v24 }
 0x1de   : > { %2036 = vmatmul.f32.vlgmr.msrb.gmra.mxu2 %v1982_v56  ;;  %2158 = vmatmul.f32.vlgmr.msra.gmra.mxu3 %v1981_v2 }
 0x1df   : > { %2228 = vmatpush.msrb.mxu2 %v1856_v54  ;;  %2306 = vmatpush.msra.mxu0 %v2261_v51 }
 0x1e0   : > { %2324 = vmatpush.msra.mxu1 %v2279_v27 }
 0x1e1   : > { %2307 = vmatpush.msra.mxu0 %v2260_v35 }
 0x1e2   : > { %2325 = vmatpush.msra.mxu1 %v2278_v53 }
 0x1e3   : > { %2308 = vmatpush.msra.mxu0 %v2259_v40 }
 0x1e4   : > { %2326 = vmatpush.msra.mxu1 %v2277_v57 }
 0x1e5   : > { %2309 = vmatpush.msra.mxu0 %v2258_v50 }
 0x1e6   : > { %2132 = vmatmul.f32.vlgmr.msra.gmra.mxu2 %v1985_v3  ;;  %2252 = vmatmul.f32.vlgmr.msrb.gmra.mxu3 %v1981_v2 }
 0x1e7   : > { %2327 = vmatpush.msra.mxu1 %v2276_v63 }
 0x1e9   : > { %2328 = vmatpush.msra.mxu1 %v2275_v1 }
 0x1eb   : > { %2329 = vmatpush.msra.mxu1 %v2274_v21 }
 0x1ee   : > { %2230 = vmatmul.f32.vlgmr.msrb.gmra.mxu2 %v1981_v2 }
 0x22d   : > { %v1886_v55 = vpop.f32.mrf.mxu0 }
 0x22f   : > { %v1910_v15 = vpop.f32.mrf.mxu1 }
 0x231   : > { %v3679_v10 = vpop.f32.mrf.mxu3 }
 0x235   : > { %v1987_v33 = vpop.f32.mrf.mxu0 }
 0x237   : > { %v2013_v30 = vpop.f32.mrf.mxu1 }
 0x238   : > { %v2014_v54 = vadd.f32 %v2013_v30, %v1987_v33 }
 0x239   : > { %v1690_v7 = vpop.f32.mrf.mxu2  ;;  %v3696_v36 = vpop.f32.mrf.mxu3 }
 0x23a   : > { %v1717_v12 = vadd.f32 %v3679_v10, %v1690_v7 }
 0x23d   : > { %v2085_v61 = vpop.f32.mrf.mxu0 }
 0x23f   : > { %v2107_v49 = vpop.f32.mrf.mxu1 }
 0x241   : > { %v1740_v22 = vpop.f32.mrf.mxu2  ;;  %v1810_v25 = vpop.f32.mrf.mxu3 }
 0x242   : > { %v1741_v26 = vadd.f32 %v1740_v22, %v1717_v12 }
 0x244   : > { %v1765_v31 = vadd.f32 %v3696_v36, %v1741_v26 }
 0x245   : > { %v2183_v4 = vpop.f32.mrf.mxu0 }
 0x247   : > { %v2207_v34 = vpop.f32.mrf.mxu1 }
 0x249   : > { %v1788_v14 = vpop.f32.mrf.mxu2  ;;  %v1862_v29 = vpop.f32.mrf.mxu3 }
 0x24a   : > { %v1789_v59 = vadd.f32 %v1788_v14, %v1765_v31 }
 0x24c   : > { %v1811_v56 = vadd.f32 %v1810_v25, %v1789_v59 }
 0x24e   : > { %v1959_v43 = vmul.f32 %v2484_v38, %v1811_v56 }
 0x251   : > { %v1836_v60 = vpop.f32.mrf.mxu2  ;;  %v1956_v8 = vpop.f32.mrf.mxu3 }
 0x252   : > { %v1863_v6 = vadd.f32 %v1862_v29, %v1836_v60 }
 0x254   : > { %v1887_v58 = vadd.f32 %v1886_v55, %v1863_v6 }
 0x256   : > { %v1911_v23 = vadd.f32 %v1910_v15, %v1887_v58 }
 0x259   : > { %v1934_v18 = vpop.f32.mrf.mxu2  ;;  %v2061_v48 = vpop.f32.mrf.mxu3 }
 0x25a   : > { %v1935_v5 = vadd.f32 %v1934_v18, %v1911_v23 }
 0x25c   : > { %v1957_v7 = vadd.f32 %v1956_v8, %v1935_v5 }
 0x25e   : > { %v1960_v46 = vmul.f32 %v2485_v17, %v1957_v7 }
 0x261   : > { %v2037_v2 = vpop.f32.mrf.mxu2  ;;  %v2159_v37 = vpop.f32.mrf.mxu3 }
 0x262   : > { %v2038_v47 = vadd.f32 %v2037_v2, %v2014_v54 }
 0x264   : > { %v2062_v52 = vadd.f32 %v2061_v48, %v2038_v47 }
 0x266   : > { %v2086_v16 = vadd.f32 %v2085_v61, %v2062_v52 }
 0x268   : > { %v2108_v3 = vadd.f32 %v2107_v49, %v2086_v16 }
 0x269   : > { %v2133_v39 = vpop.f32.mrf.mxu2  ;;  %v2253_v32 = vpop.f32.mrf.mxu3 }
 0x26a   : > { %v2160_v10 = vadd.f32 %v2159_v37, %v2133_v39  ;;  %v2256_v62 = vadd.f32 %v2108_v3, %v1959_v43 }
 0x26c   : > { %v2184_v11 = vadd.f32 %v2183_v4, %v2160_v10  ;;  %2310 = vmatmul.f32.vlgmr.msra.gmra.mxu0 %v2256_v62 }
 0x26e   : > { %v2208_v36 = vadd.f32 %v2207_v34, %v2184_v11 }
 0x271   : > { %v2231_v44 = vpop.f32.mrf.mxu2 }
 0x272   : > { %v2232_v13 = vadd.f32 %v2231_v44, %v2208_v36 }
 0x274   : > { %v2254_v19 = vadd.f32 %v2253_v32, %v2232_v13 }
 0x276   : > { %v2257_v9 = vadd.f32 %v2254_v19, %v1960_v46 }
 0x278   : > { %2330 = vmatmul.f32.vlgmr.msra.gmra.mxu1 %v2257_v9 }
 0x2e9   : > { %v2311_v22 = vpop.f32.mrf.mxu0 }
 0x2ea   : > { %v2312_v25 = vadd.f32 %v2481_v0, %v2311_v22 }
 0x2f5   : > { %v2331_v42 = vpop.f32.mrf.mxu1 }
 0x2f6   : > { %v2332_v28 = vadd.f32 %v2331_v42, %v2312_v25 }
 0x2f8   : > { %2334 = vst [vmem:[%s242_s12] sm:$0xff] %v2332_v28 }
 0x2f9   : > { %2543 = shalt.err (!%p2540_p4)
}
 0x2fa   : > { %2437 = dma.vmem_to_hbm [thread:$0]  (%p2664_p11), %s2349_s13, 128, %s2351_s14, %s2336_s22  }
 0x2fb PF: > { %s2362_s7 = sand.u32 1, %s2570_s18   ;;  %p4106_p7 = scmp.ge.s32.totalorder %s2582_s21, 2 }
 0x2fc   : > { %s2363_s8 = scalar_lea.sflag [#allocation4], %s2362_s7 }
 0x2fd   : > { %p2444_p5 = pnand %p4106_p7, %p2668_p12 }
 0x2ff   : > { %p2445_p8 = pneg %p2444_p5 }
 0x301   : > { %2565 = dma.done.wait (%p2445_p8), %s2363_s8, 128  }
 0x302   : > { %2567 = vsyncadd (%p2445_p8), %s2363_s8, 4294967168  ;;  %p18_p10 = scmp.ge.s32.totalorder %s2639_s24, 4   ;;  %s4107_s18 = smov %s2574_s19 }
 0x303   : > { %s4108_s19 = smov %s2578_s20  ;;  %s4109_s20 = smov %s2651_s27 }
 0x304   : > { %s4110_s21 = smov %s2639_s24  ;;  %20 = sbr.rel (!%p18_p10) target bundleno = 5 (0x5), region = 85 }
 0x309   :  { %2369 = vsyncpa [#allocation3], 1 }
 0x30a   :  { %2371 = vsyncpa [#allocation3 + $0x1], 1 }
 0x30b   :  { %2372 = vsyncpa [#allocation4], 1 }
 0x30c   :  { %2374 = vsyncpa [#allocation4 + $0x1], 1 }

</bundles_post_ra>
